<compile_context>
chip_gen: v5e
topology: v5e:2x2
jax: 0.10.0
libtpu: 0.0.40
codegen_flags: <defaults>
</compile_context>

<pallas_src>
import functools

import jax
import jax.numpy as jnp
from jax import lax
from jax.experimental import pallas as pl
from jax.experimental.pallas import tpu as pltpu
import numpy as np


def _round_up(x: int, m: int) -> int:
    return (x + m - 1) // m * m


def _class_pow2(num_classes: int) -> int:
    # Smallest power of two strictly greater than num_classes, so both the GT
    # code (gt_index * C + gt_class) and the packed output (idx, class, label)
    # unpack with shift / and only (no integer division on the VPU).
    return 1 << max(1, int(num_classes).bit_length())


def _roi_match_kernel(gt_ref, pr_ref, out_ref, *iou_out_ref,
                      iou_thresh: float, num_classes: int,
                      chunk_n: int, approx_recip: bool):
    # gt_ref:  (M_pad, 8)      f32  rows: [x0, y0, x1, y1, area, code, 0, 0]
    #          code = gt_index * C + gt_class (padded rows are all-zero, at END)
    # pr_ref:  (8, block_n)    f32  rows: [x0, y0, x1, y1, area, 0, 0, 0]
    # out_ref: (1, block_n)    i32  packed: idx << (shift+1) | class << 1 | label
    # iou_out_ref (optional): (M_pad, block_n) IoU matrix tile
    gt = gt_ref[...]                                  # (M_pad, 8), resident
    gx0 = gt[:, 0:1]; gy0 = gt[:, 1:2]; gx1 = gt[:, 2:3]; gy1 = gt[:, 3:4]
    area_g = gt[:, 4:5]                               # (M_pad, 1)
    code_g = gt[:, 5:6].astype(jnp.int32)             # (M_pad, 1), < 2^24 exact
    M = gt.shape[0]

    C = _class_pow2(num_classes)
    shift = C.bit_length() - 1
    big = jnp.int32(M * C)                            # > any valid GT code
    num_chunks = pr_ref.shape[1] // chunk_n

    def process(c, carry):
        s = pl.multiple_of(c * chunk_n, chunk_n)
        pr = pr_ref[:, pl.ds(s, chunk_n)]             # (8, chunk_n)
        px0 = pr[0:1, :]; py0 = pr[1:2, :]; px1 = pr[2:3, :]; py1 = pr[3:4, :]
        area_p = pr[4:5, :]                           # (1, chunk_n)

        # pairwise IoU (M_pad, chunk_n)
        iw = jnp.maximum(jnp.minimum(gx1, px1) - jnp.maximum(gx0, px0), 0.0)
        ih = jnp.maximum(jnp.minimum(gy1, py1) - jnp.maximum(gy0, py0), 0.0)
        inter = iw * ih
        union = area_g + area_p - inter
        # select semantics keep the 1/0 of degenerate padded pairs harmless
        iou = jnp.where(inter > 0.0,
                        inter * pl.reciprocal(union, approx=approx_recip), 0.0)

        if iou_out_ref:                               # optional HBM writeback
            iou_out_ref[0][:, pl.ds(s, chunk_n)] = iou.astype(
                iou_out_ref[0].dtype)

        # Matcher: best GT per proposal, first index on ties, single threshold.
        matched_vals = jnp.max(iou, axis=0, keepdims=True)        # (1, chunk_n)
        matched_lab = (matched_vals >= iou_thresh).astype(jnp.int32)

        # Fused argmax + class gather: single min over the precomputed packed
        # code (idx dominates class since C > class, so min == first argmax).
        packed = jnp.where(iou == matched_vals, code_g, big)      # (M, chunk_n)
        packed_min = jnp.min(packed, axis=0, keepdims=True)       # (1, chunk_n)
        matched_idx = jnp.right_shift(packed_min, shift)
        cls_matched = jnp.bitwise_and(packed_min, C - 1)
        cls_out = jnp.where(matched_lab == 1, cls_matched, num_classes)

        out_code = (jnp.left_shift(matched_idx, shift + 1)
                    | jnp.left_shift(cls_out, 1) | matched_lab)
        out_ref[:, pl.ds(s, chunk_n)] = out_code
        return carry

    lax.fori_loop(0, num_chunks, process, 0, unroll=True)


@functools.partial(
    jax.jit,
    static_argnames=("iou_thresh", "num_classes", "max_block_chunks",
                     "return_iou", "approx_recip", "iou_dtype"))
def roi_heads_label_proposals(gt_boxes, gt_classes, proposal_boxes, *,
                              iou_thresh=0.5, num_classes=10,
                              max_block_chunks=8, return_iou=False,
                              approx_recip=False, iou_dtype=jnp.float32):
    """Pallas implementation of ROIHeads' pairwise IoU + Matcher + class labels.

    gt_boxes:       (M, 4) f32 xyxy
    gt_classes:     (M,)   int
    proposal_boxes: (N, 4) f32 xyxy
    Returns (matched_idxs, matched_labels, proposal_gt_classes), each (N,) i32,
    preceded by the (M, N) IoU matrix if return_iou=True.
    """
    M = gt_boxes.shape[0]
    N = proposal_boxes.shape[0]
    assert M >= 1 and N >= 1

    C = _class_pow2(num_classes)
    shift = C.bit_length() - 1
    M_pad = _round_up(M, 8)
    assert M_pad * C < (1 << 24)  # packed code travels exactly through f32

    # ---- tiling --------------------------------------------------------
    # chunk_n: lane width of the in-kernel compute sub-chunk, bounded by vreg
    # pressure (~6 live (M_pad, chunk_n) f32 temps in a 64-vreg file).
    # block_n: per-grid-step window; VMEM is never the binding resource here
    # (<0.5 MiB even at block_n=8192), so prefer one grid step when possible.
    vreg_budget_elems = 8192
    chunk_n = max(128, min(1024, (vreg_budget_elems // M_pad) // 128 * 128))
    chunk_n = min(chunk_n, _round_up(N, 128))
    block_n = min(_round_up(N, chunk_n), int(max_block_chunks) * chunk_n)
    N_pad = _round_up(N, block_n)
    grid = (N_pad // block_n,)

    # ---- slabs (single concatenate + pad each; fused under jit) ---------
    gtb = gt_boxes.astype(jnp.float32)
    area_g = (gtb[:, 2] - gtb[:, 0]) * (gtb[:, 3] - gtb[:, 1])
    code_g = (jnp.arange(M, dtype=jnp.float32) * C
              + gt_classes.astype(jnp.float32))
    gt_slab = jnp.concatenate(
        [gtb, area_g[:, None], code_g[:, None],
         jnp.zeros((M, 2), jnp.float32)], axis=1)           # (M, 8)
    # Padded zero-area GT rows go at the END (code 0 only "wins" the packed min
    # when all IoUs are 0, where it decodes to index 0 == jnp.argmax).
    gt_slab = jnp.pad(gt_slab, ((0, M_pad - M), (0, 0)))    # (M_pad, 8)

    prb = proposal_boxes.astype(jnp.float32)
    area_p = (prb[:, 2] - prb[:, 0]) * (prb[:, 3] - prb[:, 1])
    pr_slab = jnp.concatenate(
        [prb.T, area_p[None, :], jnp.zeros((3, N), jnp.float32)], axis=0)
    pr_slab = jnp.pad(pr_slab, ((0, 0), (0, N_pad - N)))    # (8, N_pad)

    kernel = functools.partial(_roi_match_kernel,
                               iou_thresh=float(iou_thresh),
                               num_classes=int(num_classes),
                               chunk_n=int(chunk_n),
                               approx_recip=bool(approx_recip))

    out_shapes = [jax.ShapeDtypeStruct((1, N_pad), jnp.int32)]
    out_specs = [pl.BlockSpec((1, block_n), lambda j: (0, j))]
    if return_iou:
        out_shapes.append(jax.ShapeDtypeStruct((M_pad, N_pad), iou_dtype))
        out_specs.append(pl.BlockSpec((M_pad, block_n), lambda j: (0, j)))

    grid_spec = pltpu.PrefetchScalarGridSpec(
        num_scalar_prefetch=0,
        grid=grid,
        in_specs=[
            pl.BlockSpec((M_pad, 8), lambda j: (0, 0)),      # GT slab (resident)
            pl.BlockSpec((8, block_n), lambda j: (0, j)),    # proposal window
        ],
        out_specs=out_specs,
    )

    outs = pl.pallas_call(
        kernel,
        out_shape=tuple(out_shapes),
        grid_spec=grid_spec,
        compiler_params=pltpu.CompilerParams(
            dimension_semantics=("parallel",)),
    )(gt_slab, pr_slab)

    packed = outs[0][0, :N]
    m_lab = jnp.bitwise_and(packed, 1)
    p_cls = jnp.bitwise_and(jnp.right_shift(packed, 1), C - 1)
    m_idx = jnp.right_shift(packed, shift + 1)
    if return_iou:
        return outs[1][:M, :N].astype(jnp.float32), m_idx, m_lab, p_cls
    return m_idx, m_lab, p_cls


def _reference(gt_boxes, gt_classes, proposal_boxes, iou_thresh, num_classes):
    """Pure-JAX reference matching detectron2 pairwise_iou + Matcher semantics."""
    g = gt_boxes[:, None, :]          # (M,1,4)
    p = proposal_boxes[None, :, :]    # (1,N,4)
    ix0 = jnp.maximum(g[..., 0], p[..., 0])
    iy0 = jnp.maximum(g[..., 1], p[..., 1])
    ix1 = jnp.minimum(g[..., 2], p[..., 2])
    iy1 = jnp.minimum(g[..., 3], p[..., 3])
    inter = jnp.maximum(ix1 - ix0, 0.0) * jnp.maximum(iy1 - iy0, 0.0)
    ag = (gt_boxes[:, 2] - gt_boxes[:, 0]) * (gt_boxes[:, 3] - gt_boxes[:, 1])
    ap = (proposal_boxes[:, 2] - proposal_boxes[:, 0]) * (
        proposal_boxes[:, 3] - proposal_boxes[:, 1])
    union = ag[:, None] + ap[None, :] - inter
    iou = jnp.where(inter > 0.0, inter / union, 0.0)
    vals = jnp.max(iou, axis=0)
    idx = jnp.argmax(iou, axis=0).astype(jnp.int32)
    lab = (vals >= iou_thresh).astype(jnp.int32)
    cls = jnp.where(lab == 1, gt_classes[idx], num_classes).astype(jnp.int32)
    return iou, idx, lab, cls


if __name__ == "__main__":
    key = jax.random.PRNGKey(0)
    NUM_CLASSES = 10
    IOU_THRESH = 0.5

    def make_inputs(k, M, N):
        k1, k2, k3, k4, k5 = jax.random.split(k, 5)
        gxy = jax.random.uniform(k1, (M, 2), minval=0.0, maxval=96.0)
        gwh = jax.random.uniform(k2, (M, 2), minval=8.0, maxval=48.0)
        gt_boxes = jnp.concatenate([gxy, gxy + gwh], axis=1)          # (M,4)
        gt_classes = jax.random.randint(k3, (M,), 0, NUM_CLASSES)
        pxy = jax.random.uniform(k4, (N, 2), minval=0.0, maxval=96.0)
        pwh = jax.random.uniform(k5, (N, 2), minval=8.0, maxval=48.0)
        proposal_boxes = jnp.concatenate([pxy, pxy + pwh], axis=1)    # (N,4)
        return gt_boxes, gt_classes, proposal_boxes

    ka, kb = jax.random.split(key)
    # (M=8, N=2048): realistic size, single grid step with 2 inner chunks.
    # (M=5, N=333): exercises GT-row and proposal-lane padding paths.
    for kk, M, N in [(ka, 8, 2048), (kb, 5, 333)]:
        gt_boxes, gt_classes, proposal_boxes = make_inputs(kk, M, N)

        # Full-output variant (IoU matrix returned) — used here for validation.
        iou, m_idx, m_lab, p_cls = roi_heads_label_proposals(
            gt_boxes, gt_classes, proposal_boxes,
            iou_thresh=IOU_THRESH, num_classes=NUM_CLASSES, return_iou=True)
        # Fast path (no IoU writeback) — what ROIHeads matching actually needs.
        m_idx2, m_lab2, p_cls2 = roi_heads_label_proposals(
            gt_boxes, gt_classes, proposal_boxes,
            iou_thresh=IOU_THRESH, num_classes=NUM_CLASSES, return_iou=False)
        jax.block_until_ready((iou, m_idx, m_lab, p_cls,
                               m_idx2, m_lab2, p_cls2))

        r_iou, r_idx, r_lab, r_cls = _reference(
            gt_boxes, gt_classes, proposal_boxes, IOU_THRESH, NUM_CLASSES)

        np.testing.assert_allclose(np.asarray(iou), np.asarray(r_iou),
                                   rtol=1e-5, atol=1e-5)
        for got in ((m_idx, m_lab, p_cls), (m_idx2, m_lab2, p_cls2)):
            np.testing.assert_array_equal(np.asarray(got[0]), np.asarray(r_idx))
            np.testing.assert_array_equal(np.asarray(got[1]), np.asarray(r_lab))
            np.testing.assert_array_equal(np.asarray(got[2]), np.asarray(r_cls))

    print("KERNEL_OK")
</pallas_src>

<mosaic_0001>
module attributes {stable_mosaic.version = 11 : i64} {
  func.func @_roi_match_kernel(%arg0: i32, %arg1: memref<8x8xf32, #tpu.memory_space<vmem>>, %arg2: memref<8x2048xf32, #tpu.memory_space<vmem>>, %arg3: memref<1x2048xi32, #tpu.memory_space<vmem>>, %arg4: memref<8x2048xf32, #tpu.memory_space<vmem>>) attributes {dimension_semantics = [#tpu.dimension_semantics<parallel>], iteration_bounds = array<i64: 1>, scalar_prefetch = 0 : i64, scratch_operands = 0 : i64, tpu.core_type = #tpu.core_type<tc>, window_params = [{pipeline_mode = #tpu.pipeline_mode<synchronous>, transform_indices = @transform_0, window_bounds = array<i64: 8, 8>}, {transform_indices = @transform_1, window_bounds = array<i64: 8, 2048>}, {transform_indices = @transform_2, window_bounds = array<i64: 1, 2048>}, {transform_indices = @transform_3, window_bounds = array<i64: 8, 2048>}]} {
    %c0 = arith.constant 0 : index
    %c0_0 = arith.constant 0 : index
    %0 = vector.load %arg1[%c0, %c0_0] : memref<8x8xf32, #tpu.memory_space<vmem>>, vector<8x8xf32>
    %1 = vector.extract_strided_slice %0 {offsets = [0, 0], sizes = [8, 1], strides = [1, 1]} : vector<8x8xf32> to vector<8x1xf32>
    %2 = vector.extract_strided_slice %0 {offsets = [0, 1], sizes = [8, 1], strides = [1, 1]} : vector<8x8xf32> to vector<8x1xf32>
    %3 = vector.extract_strided_slice %0 {offsets = [0, 2], sizes = [8, 1], strides = [1, 1]} : vector<8x8xf32> to vector<8x1xf32>
    %4 = vector.extract_strided_slice %0 {offsets = [0, 3], sizes = [8, 1], strides = [1, 1]} : vector<8x8xf32> to vector<8x1xf32>
    %5 = vector.extract_strided_slice %0 {offsets = [0, 4], sizes = [8, 1], strides = [1, 1]} : vector<8x8xf32> to vector<8x1xf32>
    %6 = vector.extract_strided_slice %0 {offsets = [0, 5], sizes = [8, 1], strides = [1, 1]} : vector<8x8xf32> to vector<8x1xf32>
    %7 = arith.fptosi %6 : vector<8x1xf32> to vector<8x1xi32>
    %c128_i32 = arith.constant 128 : i32
    %c0_i32 = arith.constant 0 : i32
    %c1024_i32 = arith.constant 1024 : i32
    %8 = arith.muli %c0_i32, %c1024_i32 : i32
    %9 = tpu.assume_multiple %8, 1024 : i32
    %c0_1 = arith.constant 0 : index
    %10 = arith.index_cast %9 : i32 to index
    %11 = vector.load %arg2[%c0_1, %10] : memref<8x2048xf32, #tpu.memory_space<vmem>>, vector<8x1024xf32>
    %12 = vector.extract_strided_slice %11 {offsets = [0, 0], sizes = [1, 1024], strides = [1, 1]} : vector<8x1024xf32> to vector<1x1024xf32>
    %13 = vector.extract_strided_slice %11 {offsets = [1, 0], sizes = [1, 1024], strides = [1, 1]} : vector<8x1024xf32> to vector<1x1024xf32>
    %14 = vector.extract_strided_slice %11 {offsets = [2, 0], sizes = [1, 1024], strides = [1, 1]} : vector<8x1024xf32> to vector<1x1024xf32>
    %15 = vector.extract_strided_slice %11 {offsets = [3, 0], sizes = [1, 1024], strides = [1, 1]} : vector<8x1024xf32> to vector<1x1024xf32>
    %16 = vector.extract_strided_slice %11 {offsets = [4, 0], sizes = [1, 1024], strides = [1, 1]} : vector<8x1024xf32> to vector<1x1024xf32>
    %17 = vector.broadcast %3 : vector<8x1xf32> to vector<8x1024xf32>
    %18 = vector.broadcast %14 : vector<1x1024xf32> to vector<8x1024xf32>
    %19 = arith.minimumf %17, %18 : vector<8x1024xf32>
    %20 = vector.broadcast %1 : vector<8x1xf32> to vector<8x1024xf32>
    %21 = vector.broadcast %12 : vector<1x1024xf32> to vector<8x1024xf32>
    %22 = arith.maximumf %20, %21 : vector<8x1024xf32>
    %23 = arith.subf %19, %22 : vector<8x1024xf32>
    %cst = arith.constant 0.000000e+00 : f32
    %24 = vector.broadcast %cst : f32 to vector<8x1024xf32>
    %25 = arith.maximumf %23, %24 : vector<8x1024xf32>
    %26 = vector.broadcast %4 : vector<8x1xf32> to vector<8x1024xf32>
    %27 = vector.broadcast %15 : vector<1x1024xf32> to vector<8x1024xf32>
    %28 = arith.minimumf %26, %27 : vector<8x1024xf32>
    %29 = vector.broadcast %2 : vector<8x1xf32> to vector<8x1024xf32>
    %30 = vector.broadcast %13 : vector<1x1024xf32> to vector<8x1024xf32>
    %31 = arith.maximumf %29, %30 : vector<8x1024xf32>
    %32 = arith.subf %28, %31 : vector<8x1024xf32>
    %cst_2 = arith.constant 0.000000e+00 : f32
    %33 = vector.broadcast %cst_2 : f32 to vector<8x1024xf32>
    %34 = arith.maximumf %32, %33 : vector<8x1024xf32>
    %35 = arith.mulf %25, %34 : vector<8x1024xf32>
    %36 = vector.broadcast %5 : vector<8x1xf32> to vector<8x1024xf32>
    %37 = vector.broadcast %16 : vector<1x1024xf32> to vector<8x1024xf32>
    %38 = arith.addf %36, %37 : vector<8x1024xf32>
    %39 = arith.subf %38, %35 : vector<8x1024xf32>
    %cst_3 = arith.constant 0.000000e+00 : f32
    %40 = vector.broadcast %cst_3 : f32 to vector<8x1024xf32>
    %41 = arith.cmpf ogt, %35, %40 : vector<8x1024xf32>
    %42 = tpu.reciprocal %39 : vector<8x1024xf32> -> vector<8x1024xf32>
    %43 = arith.mulf %35, %42 : vector<8x1024xf32>
    %cst_4 = arith.constant 0.000000e+00 : f32
    %44 = vector.broadcast %cst_4 : f32 to vector<8x1024xf32>
    %45 = arith.select %41, %43, %44 : vector<8x1024xi1>, vector<8x1024xf32>
    %c0_5 = arith.constant 0 : index
    %46 = arith.index_cast %9 : i32 to index
    %47 = vector.load %arg4[%c0_5, %46] : memref<8x2048xf32, #tpu.memory_space<vmem>>, vector<8x1024xf32>
    tpu.vector_store %arg4[%c0_5, %46], %45 {strides = array<i32>} : memref<8x2048xf32, #tpu.memory_space<vmem>>, vector<8x1024xf32>,
    %cst_6 = arith.constant dense<0xFF800000> : vector<1024xf32>
    %48 = vector.multi_reduction <maximumf>, %45, %cst_6 [0] : vector<8x1024xf32> to vector<1024xf32>
    %49 = vector.shape_cast %48 : vector<1024xf32> to vector<1x1024xf32>
    %cst_7 = arith.constant 5.000000e-01 : f32
    %50 = vector.broadcast %cst_7 : f32 to vector<1x1024xf32>
    %51 = arith.cmpf oge, %49, %50 : vector<1x1024xf32>
    %52 = arith.extui %51 : vector<1x1024xi1> to vector<1x1024xi32>
    %53 = vector.broadcast %49 : vector<1x1024xf32> to vector<8x1024xf32>
    %54 = arith.cmpf oeq, %45, %53 : vector<8x1024xf32>
    %55 = vector.shape_cast %7 : vector<8x1xi32> to vector<8x1xi32>
    %56 = vector.broadcast %55 : vector<8x1xi32> to vector<8x1024xi32>
    %57 = vector.broadcast %c128_i32 : i32 to vector<8x1024xi32>
    %58 = arith.select %54, %56, %57 : vector<8x1024xi1>, vector<8x1024xi32>
    %cst_8 = arith.constant dense<2147483647> : vector<1024xi32>
    %59 = vector.multi_reduction <minsi>, %58, %cst_8 [0] : vector<8x1024xi32> to vector<1024xi32>
    %60 = vector.shape_cast %59 : vector<1024xi32> to vector<1x1024xi32>
    %c4_i32 = arith.constant 4 : i32
    %61 = vector.broadcast %c4_i32 : i32 to vector<1x1024xi32>
    %62 = arith.shrsi %60, %61 : vector<1x1024xi32>
    %c15_i32 = arith.constant 15 : i32
    %63 = vector.broadcast %c15_i32 : i32 to vector<1x1024xi32>
    %64 = arith.andi %60, %63 : vector<1x1024xi32>
    %c1_i32 = arith.constant 1 : i32
    %65 = vector.broadcast %c1_i32 : i32 to vector<1x1024xi32>
    %66 = arith.cmpi eq, %52, %65 : vector<1x1024xi32>
    %c10_i32 = arith.constant 10 : i32
    %67 = vector.broadcast %c10_i32 : i32 to vector<1x1024xi32>
    %68 = arith.select %66, %64, %67 : vector<1x1024xi1>, vector<1x1024xi32>
    %c5_i32 = arith.constant 5 : i32
    %69 = vector.broadcast %c5_i32 : i32 to vector<1x1024xi32>
    %70 = arith.shli %62, %69 : vector<1x1024xi32>
    %c1_i32_9 = arith.constant 1 : i32
    %71 = vector.broadcast %c1_i32_9 : i32 to vector<1x1024xi32>
    %72 = arith.shli %68, %71 : vector<1x1024xi32>
    %73 = arith.ori %70, %72 : vector<1x1024xi32>
    %74 = arith.ori %73, %52 : vector<1x1024xi32>
    %c0_10 = arith.constant 0 : index
    %75 = arith.index_cast %9 : i32 to index
    %76 = vector.load %arg3[%c0_10, %75] : memref<1x2048xi32, #tpu.memory_space<vmem>>, vector<1x1024xi32>
    tpu.vector_store %arg3[%c0_10, %75], %74 {strides = array<i32>} : memref<1x2048xi32, #tpu.memory_space<vmem>>, vector<1x1024xi32>,
    %c1_i32_11 = arith.constant 1 : i32
    %c1024_i32_12 = arith.constant 1024 : i32
    %77 = arith.muli %c1_i32_11, %c1024_i32_12 : i32
    %78 = tpu.assume_multiple %77, 1024 : i32
    %c0_13 = arith.constant 0 : index
    %79 = arith.index_cast %78 : i32 to index
    %80 = vector.load %arg2[%c0_13, %79] : memref<8x2048xf32, #tpu.memory_space<vmem>>, vector<8x1024xf32>
    %81 = vector.extract_strided_slice %80 {offsets = [0, 0], sizes = [1, 1024], strides = [1, 1]} : vector<8x1024xf32> to vector<1x1024xf32>
    %82 = vector.extract_strided_slice %80 {offsets = [1, 0], sizes = [1, 1024], strides = [1, 1]} : vector<8x1024xf32> to vector<1x1024xf32>
    %83 = vector.extract_strided_slice %80 {offsets = [2, 0], sizes = [1, 1024], strides = [1, 1]} : vector<8x1024xf32> to vector<1x1024xf32>
    %84 = vector.extract_strided_slice %80 {offsets = [3, 0], sizes = [1, 1024], strides = [1, 1]} : vector<8x1024xf32> to vector<1x1024xf32>
    %85 = vector.extract_strided_slice %80 {offsets = [4, 0], sizes = [1, 1024], strides = [1, 1]} : vector<8x1024xf32> to vector<1x1024xf32>
    %86 = vector.broadcast %3 : vector<8x1xf32> to vector<8x1024xf32>
    %87 = vector.broadcast %83 : vector<1x1024xf32> to vector<8x1024xf32>
    %88 = arith.minimumf %86, %87 : vector<8x1024xf32>
    %89 = vector.broadcast %1 : vector<8x1xf32> to vector<8x1024xf32>
    %90 = vector.broadcast %81 : vector<1x1024xf32> to vector<8x1024xf32>
    %91 = arith.maximumf %89, %90 : vector<8x1024xf32>
    %92 = arith.subf %88, %91 : vector<8x1024xf32>
    %cst_14 = arith.constant 0.000000e+00 : f32
    %93 = vector.broadcast %cst_14 : f32 to vector<8x1024xf32>
    %94 = arith.maximumf %92, %93 : vector<8x1024xf32>
    %95 = vector.broadcast %4 : vector<8x1xf32> to vector<8x1024xf32>
    %96 = vector.broadcast %84 : vector<1x1024xf32> to vector<8x1024xf32>
    %97 = arith.minimumf %95, %96 : vector<8x1024xf32>
    %98 = vector.broadcast %2 : vector<8x1xf32> to vector<8x1024xf32>
    %99 = vector.broadcast %82 : vector<1x1024xf32> to vector<8x1024xf32>
    %100 = arith.maximumf %98, %99 : vector<8x1024xf32>
    %101 = arith.subf %97, %100 : vector<8x1024xf32>
    %cst_15 = arith.constant 0.000000e+00 : f32
    %102 = vector.broadcast %cst_15 : f32 to vector<8x1024xf32>
    %103 = arith.maximumf %101, %102 : vector<8x1024xf32>
    %104 = arith.mulf %94, %103 : vector<8x1024xf32>
    %105 = vector.broadcast %5 : vector<8x1xf32> to vector<8x1024xf32>
    %106 = vector.broadcast %85 : vector<1x1024xf32> to vector<8x1024xf32>
    %107 = arith.addf %105, %106 : vector<8x1024xf32>
    %108 = arith.subf %107, %104 : vector<8x1024xf32>
    %cst_16 = arith.constant 0.000000e+00 : f32
    %109 = vector.broadcast %cst_16 : f32 to vector<8x1024xf32>
    %110 = arith.cmpf ogt, %104, %109 : vector<8x1024xf32>
    %111 = tpu.reciprocal %108 : vector<8x1024xf32> -> vector<8x1024xf32>
    %112 = arith.mulf %104, %111 : vector<8x1024xf32>
    %cst_17 = arith.constant 0.000000e+00 : f32
    %113 = vector.broadcast %cst_17 : f32 to vector<8x1024xf32>
    %114 = arith.select %110, %112, %113 : vector<8x1024xi1>, vector<8x1024xf32>
    %c0_18 = arith.constant 0 : index
    %115 = arith.index_cast %78 : i32 to index
    %116 = vector.load %arg4[%c0_18, %115] : memref<8x2048xf32, #tpu.memory_space<vmem>>, vector<8x1024xf32>
    tpu.vector_store %arg4[%c0_18, %115], %114 {strides = array<i32>} : memref<8x2048xf32, #tpu.memory_space<vmem>>, vector<8x1024xf32>,
    %cst_19 = arith.constant dense<0xFF800000> : vector<1024xf32>
    %117 = vector.multi_reduction <maximumf>, %114, %cst_19 [0] : vector<8x1024xf32> to vector<1024xf32>
    %118 = vector.shape_cast %117 : vector<1024xf32> to vector<1x1024xf32>
    %cst_20 = arith.constant 5.000000e-01 : f32
    %119 = vector.broadcast %cst_20 : f32 to vector<1x1024xf32>
    %120 = arith.cmpf oge, %118, %119 : vector<1x1024xf32>
    %121 = arith.extui %120 : vector<1x1024xi1> to vector<1x1024xi32>
    %122 = vector.broadcast %118 : vector<1x1024xf32> to vector<8x1024xf32>
    %123 = arith.cmpf oeq, %114, %122 : vector<8x1024xf32>
    %124 = vector.shape_cast %7 : vector<8x1xi32> to vector<8x1xi32>
    %125 = vector.broadcast %124 : vector<8x1xi32> to vector<8x1024xi32>
    %126 = vector.broadcast %c128_i32 : i32 to vector<8x1024xi32>
    %127 = arith.select %123, %125, %126 : vector<8x1024xi1>, vector<8x1024xi32>
    %cst_21 = arith.constant dense<2147483647> : vector<1024xi32>
    %128 = vector.multi_reduction <minsi>, %127, %cst_21 [0] : vector<8x1024xi32> to vector<1024xi32>
    %129 = vector.shape_cast %128 : vector<1024xi32> to vector<1x1024xi32>
    %c4_i32_22 = arith.constant 4 : i32
    %130 = vector.broadcast %c4_i32_22 : i32 to vector<1x1024xi32>
    %131 = arith.shrsi %129, %130 : vector<1x1024xi32>
    %c15_i32_23 = arith.constant 15 : i32
    %132 = vector.broadcast %c15_i32_23 : i32 to vector<1x1024xi32>
    %133 = arith.andi %129, %132 : vector<1x1024xi32>
    %c1_i32_24 = arith.constant 1 : i32
    %134 = vector.broadcast %c1_i32_24 : i32 to vector<1x1024xi32>
    %135 = arith.cmpi eq, %121, %134 : vector<1x1024xi32>
    %c10_i32_25 = arith.constant 10 : i32
    %136 = vector.broadcast %c10_i32_25 : i32 to vector<1x1024xi32>
    %137 = arith.select %135, %133, %136 : vector<1x1024xi1>, vector<1x1024xi32>
    %c5_i32_26 = arith.constant 5 : i32
    %138 = vector.broadcast %c5_i32_26 : i32 to vector<1x1024xi32>
    %139 = arith.shli %131, %138 : vector<1x1024xi32>
    %c1_i32_27 = arith.constant 1 : i32
    %140 = vector.broadcast %c1_i32_27 : i32 to vector<1x1024xi32>
    %141 = arith.shli %137, %140 : vector<1x1024xi32>
    %142 = arith.ori %139, %141 : vector<1x1024xi32>
    %143 = arith.ori %142, %121 : vector<1x1024xi32>
    %c0_28 = arith.constant 0 : index
    %144 = arith.index_cast %78 : i32 to index
    %145 = vector.load %arg3[%c0_28, %144] : memref<1x2048xi32, #tpu.memory_space<vmem>>, vector<1x1024xi32>
    tpu.vector_store %arg3[%c0_28, %144], %143 {strides = array<i32>} : memref<1x2048xi32, #tpu.memory_space<vmem>>, vector<1x1024xi32>,
    %c2_i32 = arith.constant 2 : i32
    return
  }
  func.func @transform_0(%arg0: i32) -> (i32, i32) {
    %c0_i32 = arith.constant 0 : i32
    %c0_i32_0 = arith.constant 0 : i32
    %c0_i32_1 = arith.constant 0 : i32
    return %c0_i32, %c0_i32_0 : i32, i32
  }
  func.func @transform_1(%arg0: i32) -> (i32, i32) {
    %c0_i32 = arith.constant 0 : i32
    %c0_i32_0 = arith.constant 0 : i32
    return %c0_i32, %arg0 : i32, i32
  }
  func.func @transform_2(%arg0: i32) -> (i32, i32) {
    %c0_i32 = arith.constant 0 : i32
    %c0_i32_0 = arith.constant 0 : i32
    return %c0_i32, %arg0 : i32, i32
  }
  func.func @transform_3(%arg0: i32) -> (i32, i32) {
    %c0_i32 = arith.constant 0 : i32
    %c0_i32_0 = arith.constant 0 : i32
    return %c0_i32, %arg0 : i32, i32
  }
}

</mosaic_0001>

<bundles_post_ra>
// kernel: roi_heads_label_proposals.1
= control target key start
LH: loop header
LB: loop body
LE: loop exit
PB: predicated region body
PF: predicated region fallthrough
CT: control target
= control target key end

     0   :  { %v1178_v1 = vmov 3   ;;  %v1179_v2 = vmov 2   ;;  %s2466_s0 = inlined_call_operand.vmem [shape: f32[8,8], index: 0, kind: input, shape index: {}]   ;;  %s2467_s1 = inlined_call_operand.vmem [shape: f32[8,2048], index: 1, kind: input, shape index: {}]   ;;  %s2468_s2 = inlined_call_operand.vmem [shape: s32[1,2048], index: 2, kind: output, shape index: {0}]   ;;  %s2469_s3 = inlined_call_operand.hbm [shape: f32[8,2048], index: 3, kind: output, shape index: {1}]  }
   0x1   :  { %v14_v0 = vld [vmem:[%s2466_s0] sm:$0xff]  ;;  %1115 = vset.pattern.permute.xlu1 %v1178_v1  ;;  %1113 = vset.pattern.permute.xlu0 %v1179_v2 }
   0x2   :  { %9 = vsyncpa [#allocation3], 0  ;;  %82 = vperm.xlu1 %1115, %v14_v0   ;;  %26 = vperm.xlu0 %1113, %v14_v0   ;;  %v1102_v3 = vceil.f32 %v14_v0  ;;  %v1103_v4 = vfloor.f32 %v14_v0  ;;  %v1180_v5 = vmov 4   ;;  %vm1101_vm0 = vcmp.lt.s32.totalorder %v14_v0, 0  ;;  %v1212_v11 = vld [vmem:[%s2467_s1] sm:$0xff]  ;;  %v1217_v12 = vld [vmem:[%s2467_s1 + $0x8] sm:$0xff] }
   0x3   :  { %1117 = vset.pattern.permute.xlu2 %v1180_v5  ;;  %v1181_v8 = vmov 1   ;;  %v2470_v9 = vmov 0   ;;  %v1183_v10 = vmov 5   ;;  %v1222_v13 = vld [vmem:[%s2467_s1 + $0x10] sm:$0xff]  ;;  %v1227_v14 = vld [vmem:[%s2467_s1 + $0x18] sm:$0xff]  ;;  %v1232_v15 = vld [vmem:[%s2467_s1 + $0x20] sm:$0xff] }
   0x4   :  { %146 = vperm.xlu2 %1117, %v14_v0   ;;  %v1104_v6 = vsel %vm1101_vm0, %v1102_v3, %v1103_v4  ;;  %v1237_v16 = vld [vmem:[%s2467_s1 + $0x28] sm:$0xff]  ;;  %v1242_v17 = vld [vmem:[%s2467_s1 + $0x30] sm:$0xff]  ;;  %v1247_v18 = vld [vmem:[%s2467_s1 + $0x38] sm:$0xff]  ;;  %v85_v20 = vperm.slane %v1212_v11, 3  ;;  %v86_v21 = vperm.slane %v1217_v12, 3  ;;  %v87_v22 = vperm.slane %v1222_v13, 3 }
   0x5   :  { %v1105_v7 = vcvt.f32.s32 %v1104_v6  ;;  %v1252_v19 = vld [vmem:[%s2467_s1 + $0x40] sm:$0xff]  ;;  %v88_v23 = vperm.slane %v1227_v14, 3  ;;  %v89_v24 = vperm.slane %v1232_v15, 3  ;;  %v90_v25 = vperm.slane %v1237_v16, 3  ;;  %v1263_v26 = vld [vmem:[%s2467_s1 + $0x48] sm:$0xff]  ;;  %v1270_v29 = vld [vmem:[%s2467_s1 + $0x50] sm:$0xff] }
   0x6   :  { %v91_v27 = vperm.slane %v1242_v17, 3  ;;  %v92_v28 = vperm.slane %v1247_v18, 3  ;;  %v1275_v30 = vld [vmem:[%s2467_s1 + $0x58] sm:$0xff]  ;;  %v1280_v31 = vld [vmem:[%s2467_s1 + $0x60] sm:$0xff]  ;;  %v615_v32 = vperm.slane %v1252_v19, 3  ;;  %v105_v33 = vperm.slane %v1212_v11, 1 }
   0x7   :  { %v106_v34 = vperm.slane %v1217_v12, 1  ;;  %v107_v35 = vperm.slane %v1222_v13, 1  ;;  %v1289_v36 = vld [vmem:[%s2467_s1 + $0x68] sm:$0xff]  ;;  %v1294_v37 = vld [vmem:[%s2467_s1 + $0x70] sm:$0xff]  ;;  %v1299_v38 = vld [vmem:[%s2467_s1 + $0x78] sm:$0xff]  ;;  %v616_v44 = vperm.slane %v1263_v26, 3 }
   0x8   :  { %v617_v45 = vperm.slane %v1270_v29, 3  ;;  %v618_v46 = vperm.slane %v1275_v30, 3  ;;  %v619_v47 = vperm.slane %v1280_v31, 3  ;;  %v620_v48 = vperm.slane %v1289_v36, 3  ;;  %s1184_s1 = smov [#allocation2]   ;;  %s1081_s20 = sshll.u32 %s2469_s3, 4  ;;  %s1082_s20 = int_to_ptr.hbm [resolvable:$true] %s1081_s20 }
   0x9   :  { %v621_v49 = vperm.slane %v1294_v37, 3  ;;  %v622_v50 = vperm.slane %v1299_v38, 3  ;;  %v29_v60 = vperm.slane %v1212_v11, 2  ;;  %v30_v61 = vperm.slane %v1217_v12, 2  ;;  %s2192_s17 = sshll.u32 %s1184_s1, 4  ;;  %s1080_s17 = int_to_ptr.vmem [resolvable:$true] %s2192_s17 }
   0xa   :  { %1116 = vset.pattern.permute.xlu1 %v1181_v8  ;;  %1114 = vset.pattern.permute.xlu0 %v2470_v9  ;;  %v31_v62 = vperm.slane %v1222_v13, 2  ;;  %v32_v63 = vperm.slane %v1227_v14, 2  ;;  %v34_v1 = vperm.slane %v1237_v16, 2  ;;  %v35_v2 = vperm.slane %v1242_v17, 2 }
   0xb   :  { %102 = vperm.xlu1 %1116, %v14_v0   ;;  %46 = vperm.xlu0 %1114, %v14_v0   ;;  %v33_v0 = vperm.slane %v1232_v15, 2  ;;  %v36_v3 = vperm.slane %v1247_v18, 2  ;;  %v567_v4 = vperm.slane %v1252_v19, 2  ;;  %v568_v5 = vperm.slane %v1263_v26, 2 }
   0xc   :  { %1118 = vset.pattern.permute.xlu2 %v1183_v10  ;;  %v569_v6 = vperm.slane %v1270_v29, 2  ;;  %v571_v8 = vperm.slane %v1280_v31, 2  ;;  %v573_v9 = vperm.slane %v1294_v37, 2  ;;  %v574_v58 = vperm.slane %v1299_v38, 2 }
   0xd   :  { %390 = vperm.xlu2 %1118, %v1105_v7   ;;  %v570_v7 = vperm.slane %v1275_v30, 2 }
  0x13   :  { %1119 = vset.pattern.permute.xlu0 %v1183_v10  ;;  %v572_v10 = vperm.slane %v1289_v36, 2 }
  0x74   :  { %v83_v59 = vpop.permute.xlu1 %82  ;;  %v27_v57 = vpop.permute.xlu0 %26 }
  0x75   :  { %v93_v51 = vmin.f32 %v83_v59, %v85_v20  ;;  %v94_v42 = vmin.f32 %v83_v59, %v86_v21  ;;  %v95_v41 = vmin.f32 %v83_v59, %v87_v22  ;;  %v96_v56 = vmin.f32 %v83_v59, %v88_v23 }
  0x76   :  { %v97_v54 = vmin.f32 %v83_v59, %v89_v24  ;;  %v98_v53 = vmin.f32 %v83_v59, %v90_v25  ;;  %v99_v55 = vmin.f32 %v83_v59, %v91_v27  ;;  %v1369_v20 = vmin.f32 %v83_v59, %v92_v28 }
  0x77   :  { %v1373_v21 = vmin.f32 %v83_v59, %v615_v32  ;;  %v1375_v22 = vmin.f32 %v83_v59, %v616_v44  ;;  %v1377_v23 = vmin.f32 %v83_v59, %v617_v45  ;;  %v1379_v52 = vmin.f32 %v83_v59, %v618_v46 }
  0x78   :  { %v1381_v43 = vmin.f32 %v83_v59, %v619_v47  ;;  %v1383_v25 = vmin.f32 %v83_v59, %v620_v48  ;;  %v1385_v27 = vmin.f32 %v83_v59, %v621_v49  ;;  %v1387_v40 = vmin.f32 %v83_v59, %v622_v50 }
  0x79   :  { %v1389_v28 = vmin.f32 %v27_v57, %v29_v60  ;;  %v1391_v39 = vmin.f32 %v27_v57, %v30_v61  ;;  %v1393_v32 = vmin.f32 %v27_v57, %v31_v62  ;;  %v1395_v44 = vmin.f32 %v27_v57, %v32_v63 }
  0x7a   :  { %v1401_v47 = vmin.f32 %v27_v57, %v33_v0  ;;  %v1403_v48 = vmin.f32 %v27_v57, %v34_v1  ;;  %v2490_v50 = vperm.slane %v1227_v14, 1  ;;  %v1409_v60 = vmin.f32 %v27_v57, %v35_v2 }
  0x7b   :  { %2487 = vst [vmem:[#allocation5_spill] sm:$0xff] %v1395_v44  ;;  %v1411_v61 = vmin.f32 %v27_v57, %v36_v3  ;;  %v2493_v62 = vperm.slane %v1232_v15, 1  ;;  %v2494_v63 = vperm.slane %v1237_v16, 1  ;;  %v1417_v0 = vmin.f32 %v27_v57, %v567_v4 }
  0x7c   :  { %2488 = vst [vmem:[#allocation6_spill] sm:$0xff] %v1401_v47  ;;  %v1419_v1 = vmin.f32 %v27_v57, %v568_v5  ;;  %v1423_v47 = vmin.f32 %v27_v57, %v569_v6  ;;  %v1427_v2 = vmin.f32 %v27_v57, %v571_v8  ;;  %v2499_v3 = vperm.slane %v1247_v18, 1 }
  0x7d   :  { %v103_v24 = vpop.permute.xlu1 %102  ;;  %2489 = vst [vmem:[#allocation7_spill] sm:$0xff] %v1403_v48  ;;  %v2496_v48 = vperm.slane %v1242_v17, 1  ;;  %v1431_v44 = vmin.f32 %v27_v57, %v572_v10  ;;  %v1433_v5 = vmin.f32 %v27_v57, %v573_v9 }
  0x7e   :  { %v113_v45 = vmax.f32 %v103_v24, %v105_v33  ;;  %v114_v46 = vmax.f32 %v103_v24, %v106_v34  ;;  %v115_v49 = vmax.f32 %v103_v24, %v107_v35  ;;  %v116_v59 = vmax.f32 %v103_v24, %v2490_v50  ;;  %2491 = vst [vmem:[#allocation8_spill] sm:$0xff] %v1409_v60 }
  0x7f   :  { %2492 = vst [vmem:[#allocation9_spill] sm:$0xff] %v1411_v61  ;;  %v117_v33 = vmax.f32 %v103_v24, %v2493_v62  ;;  %v118_v34 = vmax.f32 %v103_v24, %v2494_v63  ;;  %v119_v35 = vmax.f32 %v103_v24, %v2496_v48  ;;  %v1425_v50 = vmin.f32 %v27_v57, %v570_v7 }
  0x80   :  { %2495 = vst [vmem:[#allocation10_spill] sm:$0xff] %v1419_v1  ;;  %v120_v61 = vmax.f32 %v103_v24, %v2499_v3  ;;  %v121_v62 = vsub.f32 %v93_v51, %v113_v45  ;;  %v122_v60 = vsub.f32 %v94_v42, %v114_v46  ;;  %v123_v4 = vsub.f32 %v95_v41, %v115_v49  ;;  %v47_v49 = vpop.permute.xlu0 %46 }
  0x81   :  { %2497 = vst [vmem:[#allocation11_spill] sm:$0xff] %v1425_v50  ;;  %v124_v63 = vsub.f32 %v96_v56, %v116_v59  ;;  %v1435_v1 = vmin.f32 %v27_v57, %v574_v58  ;;  %v125_v48 = vsub.f32 %v97_v54, %v117_v33  ;;  %v126_v6 = vsub.f32 %v98_v53, %v118_v34 }
  0x82   :  { %2498 = vst [vmem:[#allocation12_spill] sm:$0xff] %v1427_v2  ;;  %v127_v2 = vsub.f32 %v99_v55, %v119_v35  ;;  %v2500_v50 = vperm.slane %v1252_v19, 1  ;;  %v128_v41 = vsub.f32 %v1369_v20, %v120_v61  ;;  %v1444_v9 = vmax.f32 %v121_v62, 0.0 }
  0x83   :  { %v1446_v56 = vmax.f32 %v122_v60, 0.0  ;;  %v2501_v53 = vperm.slane %v1263_v26, 1  ;;  %v1450_v57 = vmax.f32 %v123_v4, 0.0  ;;  %v1452_v58 = vmax.f32 %v124_v63, 0.0 }
  0x84   :  { %v639_v3 = vmax.f32 %v103_v24, %v2500_v50  ;;  %v2502_v55 = vperm.slane %v1270_v29, 1  ;;  %v2503_v45 = vperm.slane %v1275_v30, 1  ;;  %v1458_v59 = vmax.f32 %v125_v48, 0.0 }
  0x85   :  { %v640_v54 = vmax.f32 %v103_v24, %v2501_v53  ;;  %v1460_v20 = vmax.f32 %v126_v6, 0.0  ;;  %v2504_v60 = vperm.slane %v1280_v31, 1  ;;  %v2505_v33 = vperm.slane %v1289_v36, 1 }
  0x86   :  { %v641_v10 = vmax.f32 %v103_v24, %v2502_v55  ;;  %v642_v46 = vmax.f32 %v103_v24, %v2503_v45  ;;  %v1466_v35 = vmax.f32 %v127_v2, 0.0  ;;  %v2506_v50 = vperm.slane %v1294_v37, 1 }
  0x87   :  { %v643_v61 = vmax.f32 %v103_v24, %v2504_v60  ;;  %v644_v34 = vmax.f32 %v103_v24, %v2505_v33  ;;  %v2507_v4 = vperm.slane %v1299_v38, 1  ;;  %v647_v53 = vsub.f32 %v1373_v21, %v639_v3 }
  0x88   :  { %v645_v62 = vmax.f32 %v103_v24, %v2506_v50  ;;  %v1473_v48 = vmax.f32 %v128_v41, 0.0  ;;  %v648_v6 = vsub.f32 %v1375_v22, %v640_v54  ;;  %v2508_v55 = vperm.slane %v1212_v11, 0 }
  0x89   :  { %v646_v63 = vmax.f32 %v103_v24, %v2507_v4  ;;  %v2509_v60 = vperm.slane %v1217_v12, 0  ;;  %v649_v2 = vsub.f32 %v1377_v23, %v641_v10  ;;  %v650_v51 = vsub.f32 %v1379_v52, %v642_v46 }
  0x8a   :  { %v57_v45 = vmax.f32 %v47_v49, %v2508_v55  ;;  %v2510_v50 = vperm.slane %v1222_v13, 0  ;;  %v2511_v24 = vperm.slane %v1227_v14, 0  ;;  %v651_v3 = vsub.f32 %v1381_v43, %v643_v61 }
  0x8b   :  { %v58_v33 = vmax.f32 %v47_v49, %v2509_v60  ;;  %v652_v22 = vsub.f32 %v1383_v25, %v644_v34  ;;  %v2512_v41 = vperm.slane %v1232_v15, 0  ;;  %v2513_v4 = vperm.slane %v1237_v16, 0 }
  0x8c   :  { %v59_v42 = vmax.f32 %v47_v49, %v2510_v50  ;;  %v60_v21 = vmax.f32 %v47_v49, %v2511_v24  ;;  %v653_v23 = vsub.f32 %v1385_v27, %v645_v62  ;;  %v654_v52 = vsub.f32 %v1387_v40, %v646_v63  ;;  %v2516_v27 = vld [vmem:[#allocation5_spill] sm:$0xff] }
  0x8d   :  { %v61_v54 = vmax.f32 %v47_v49, %v2512_v41  ;;  %v62_v55 = vmax.f32 %v47_v49, %v2513_v4  ;;  %v1494_v10 = vmax.f32 %v647_v53, 0.0  ;;  %v2514_v46 = vperm.slane %v1242_v17, 0  ;;  %v2517_v53 = vld [vmem:[#allocation6_spill] sm:$0xff]  ;;  %v2518_v4 = vld [vmem:[#allocation7_spill] sm:$0xff] }
  0x8e   :  { %v1498_v50 = vmax.f32 %v648_v6, 0.0  ;;  %v2515_v43 = vperm.slane %v1247_v18, 0  ;;  %v65_v61 = vsub.f32 %v1389_v28, %v57_v45  ;;  %v66_v34 = vsub.f32 %v1391_v39, %v58_v33 }
  0x8f   :  { %v63_v60 = vmax.f32 %v47_v49, %v2514_v46  ;;  %v1504_v24 = vmax.f32 %v649_v2, 0.0  ;;  %v1506_v41 = vmax.f32 %v650_v51, 0.0  ;;  %v67_v40 = vsub.f32 %v1393_v32, %v59_v42  ;;  %v2520_v51 = vld [vmem:[#allocation8_spill] sm:$0xff]  ;;  %v2521_v2 = vld [vmem:[#allocation9_spill] sm:$0xff] }
  0x90   :  { %v64_v25 = vmax.f32 %v47_v49, %v2515_v43  ;;  %v68_v62 = vsub.f32 %v2516_v27, %v60_v21  ;;  %v1510_v63 = vmax.f32 %v651_v3, 0.0  ;;  %v69_v6 = vsub.f32 %v2517_v53, %v61_v54 }
  0x91   :  { %v70_v46 = vsub.f32 %v2518_v4, %v62_v55  ;;  %v2519_v43 = vperm.slane %v1299_v38, 0  ;;  %v1516_v28 = vmax.f32 %v652_v22, 0.0  ;;  %v1518_v39 = vmax.f32 %v653_v23, 0.0 }
  0x92   :  { %v662_v45 = vmax.f32 %v654_v52, 0.0  ;;  %v71_v33 = vsub.f32 %v2520_v51, %v63_v60  ;;  %v72_v32 = vsub.f32 %v2521_v2, %v64_v25  ;;  %v73_v42 = vmax.f32 %v65_v61, 0.0 }
  0x93   :  { %v598_v8 = vmax.f32 %v47_v49, %v2519_v43  ;;  %v74_v21 = vmax.f32 %v66_v34, 0.0  ;;  %v75_v27 = vmax.f32 %v67_v40, 0.0  ;;  %v76_v54 = vmax.f32 %v68_v62, 0.0 }
  0x94   :  { %v2522_v55 = vperm.slane %v1252_v19, 0  ;;  %v2523_v4 = vperm.slane %v1263_v26, 0  ;;  %v77_v43 = vmax.f32 %v69_v6, 0.0  ;;  %v78_v23 = vmax.f32 %v70_v46, 0.0 }
  0x95   :  { %v606_v3 = vsub.f32 %v1435_v1, %v598_v8  ;;  %v2524_v52 = vperm.slane %v1270_v29, 0  ;;  %v79_v51 = vmax.f32 %v71_v33, 0.0  ;;  %v2525_v25 = vperm.slane %v1275_v30, 0 }
  0x96   :  { %v591_v53 = vmax.f32 %v47_v49, %v2522_v55  ;;  %v592_v22 = vmax.f32 %v47_v49, %v2523_v4  ;;  %v2526_v1 = vperm.slane %v1280_v31, 0  ;;  %v2527_v34 = vperm.slane %v1289_v36, 0 }
  0x97   :  { %v593_v7 = vmax.f32 %v47_v49, %v2524_v52  ;;  %v614_v60 = vmax.f32 %v606_v3, 0.0  ;;  %v594_v61 = vmax.f32 %v47_v49, %v2525_v25  ;;  %v80_v62 = vmax.f32 %v72_v32, 0.0  ;;  %v2529_v52 = vld [vmem:[#allocation10_spill] sm:$0xff] }
  0x98   :  { %v595_v8 = vmax.f32 %v47_v49, %v2526_v1  ;;  %v596_v40 = vmax.f32 %v47_v49, %v2527_v34  ;;  %v1536_v2 = vmul.f32 %v1444_v9, %v73_v42  ;;  %v1539_v6 = vmul.f32 %v1446_v56, %v74_v21  ;;  %v1550_v1 = vpop.permute.xlu2 %146  ;;  %v2531_v42 = vld [vmem:[#allocation12_spill] sm:$0xff] }
  0x99   :  { %v1541_v46 = vmul.f32 %v662_v45, %v614_v60  ;;  %v1544_v33 = vmul.f32 %v1450_v57, %v75_v27  ;;  %v2528_v3 = vperm.slane %v1294_v37, 0  ;;  %v599_v4 = vsub.f32 %v1417_v0, %v591_v53 }
  0x9a   :  { %v600_v25 = vsub.f32 %v2529_v52, %v592_v22  ;;  %v1553_v9 = vmul.f32 %v1452_v58, %v76_v54  ;;  %v1556_v56 = vmul.f32 %v1458_v59, %v77_v43  ;;  %v1559_v45 = vmul.f32 %v1460_v20, %v78_v23 }
  0x9b   :  { %v597_v55 = vmax.f32 %v47_v49, %v2528_v3  ;;  %v601_v57 = vsub.f32 %v1423_v47, %v593_v7  ;;  %v1563_v32 = vmul.f32 %v1466_v35, %v79_v51  ;;  %v2530_v49 = vld [vmem:[#allocation11_spill] sm:$0xff]  ;;  %v603_v21 = vsub.f32 %v2531_v42, %v595_v8 }
  0x9c   :  { %v602_v0 = vsub.f32 %v2530_v49, %v594_v61  ;;  %v604_v27 = vsub.f32 %v1431_v44, %v596_v40  ;;  %v153_v58 = vperm.slane %v1232_v15, 4  ;;  %v2532_v59 = vperm.slane %v1212_v11, 4 }
  0x9d   :  { %v2533_v20 = vperm.slane %v1217_v12, 4  ;;  %v2534_v47 = vperm.slane %v1222_v13, 4  ;;  %v605_v35 = vsub.f32 %v1433_v5, %v597_v55  ;;  %v607_v22 = vmax.f32 %v599_v4, 0.0 }
  0x9e   :  { %v157_v54 = vadd.f32 %v2532_v59, %v1550_v1  ;;  %v608_v43 = vmax.f32 %v600_v25, 0.0  ;;  %v154_v44 = vperm.slane %v1237_v16, 4  ;;  %v609_v23 = vmax.f32 %v601_v57, 0.0 }
  0x9f   :  { %v158_v53 = vadd.f32 %v2533_v20, %v1550_v1  ;;  %v159_v7 = vadd.f32 %v2534_v47, %v1550_v1  ;;  %v155_v15 = vperm.slane %v1242_v17, 4  ;;  %v610_v12 = vmax.f32 %v602_v0, 0.0 }
  0xa0   :  { %v1582_v11 = vsub.f32 %v157_v54, %v1536_v2  ;;  %v611_v51 = vmax.f32 %v603_v21, 0.0  ;;  %v156_v13 = vperm.slane %v1247_v18, 4  ;;  %v2535_v5 = vperm.slane %v1227_v14, 4 }
  0xa1   :  { %v1585_v60 = vsub.f32 %v158_v53, %v1539_v6  ;;  %v1592_v8 = vmul.f32 %v1473_v48, %v80_v62  ;;  %v161_v16 = vadd.f32 %v153_v58, %v1550_v1  ;;  %v1596_v17 = vsub.f32 %v159_v7, %v1544_v33 }
  0xa2   :  { %v160_v61 = vadd.f32 %v2535_v5, %v1550_v1  ;;  %1120 = vrcp.f32 %v1582_v11  ;;  %v612_v34 = vmax.f32 %v604_v27, 0.0  ;;  %v613_v40 = vmax.f32 %v605_v35, 0.0 }
  0xa3   :  { %v162_v3 = vadd.f32 %v154_v44, %v1550_v1  ;;  %1122 = vrcp.f32 %v1585_v60  ;;  %v1602_v18 = vmul.f32 %v1494_v10, %v607_v22  ;;  %v1605_v14 = vmul.f32 %v1498_v50, %v608_v43 }
  0xa4   :  { %v1608_v48 = vmul.f32 %v1504_v24, %v609_v23  ;;  %v163_v62 = vadd.f32 %v155_v15, %v1550_v1  ;;  %v1612_v55 = vmul.f32 %v1506_v41, %v610_v12  ;;  %v1615_v4 = vmul.f32 %v1510_v63, %v611_v51 }
  0xa5   :  { %v164_v52 = vadd.f32 %v156_v13, %v1550_v1  ;;  %v1619_v25 = vsub.f32 %v160_v61, %v1553_v9  ;;  %v671_v10 = vperm.slane %v1252_v19, 4  ;;  %v672_v50 = vperm.slane %v1263_v26, 4 }
  0xa6   :  { %v1624_v24 = vsub.f32 %v161_v16, %v1556_v56  ;;  %1124 = vrcp.f32 %v1596_v17  ;;  %v1628_v41 = vmul.f32 %v1516_v28, %v612_v34  ;;  %v1631_v63 = vmul.f32 %v1518_v39, %v613_v40 }
  0xa7   :  { %v673_v57 = vperm.slane %v1270_v29, 4  ;;  %v1635_v49 = vsub.f32 %v162_v3, %v1559_v45  ;;  %v674_v19 = vperm.slane %v1275_v30, 4  ;;  %v675_v26 = vperm.slane %v1280_v31, 4 }
  0xa8   :  { %v1121_v0 = vpop.eup %1120  ;;  %v676_v42 = vperm.slane %v1289_v36, 4  ;;  %v1641_v21 = vsub.f32 %v163_v62, %v1563_v32  ;;  %v677_v27 = vperm.slane %v1294_v37, 4  ;;  %v678_v39 = vperm.slane %v1299_v38, 4 }
  0xa9   :  { %v1123_v28 = vpop.eup %1122  ;;  %v1646_v29 = vsub.f32 %v164_v52, %v1592_v8  ;;  %1126 = vrcp.f32 %v1619_v25  ;;  %v1651_v30 = vadd.f32 %v671_v10, %v1550_v1  ;;  %v1654_v58 = vadd.f32 %v672_v50, %v1550_v1 }
  0xaa   :  { %1128 = vrcp.f32 %v1624_v24  ;;  %v182_v59 = vmul.f32 %v1121_v0, %v1582_v11  ;;  %v1659_v54 = vadd.f32 %v673_v57, %v1550_v1  ;;  %v190_v20 = vand.u32 2147483647, %v1582_v11 }
  0xab   :  { %1130 = vrcp.f32 %v1635_v49  ;;  %v196_v53 = vmul.f32 %v1123_v28, %v1585_v60  ;;  %v1665_v7 = vadd.f32 %v674_v19, %v1550_v1  ;;  %v192_v22 = vand.u32 2147483648, %v1582_v11 }
  0xac   :  { %v1125_v47 = vpop.eup %1124  ;;  %1132 = vrcp.f32 %v1641_v21  ;;  %v183_v35 = vsub.f32 1.0, %v182_v59  ;;  %vm186_vm1 = vweird.f32 %v1582_v11  ;;  %vm187_vm2 = vweird.f32 %v1121_v0 }
  0xad   :  { %1134 = vrcp.f32 %v1646_v29  ;;  %v197_v43 = vsub.f32 1.0, %v196_v53  ;;  %vm200_vm3 = vweird.f32 %v1585_v60  ;;  %v204_v23 = vand.u32 2147483647, %v1585_v60  ;;  %vm188_vm8 = vmor %vm186_vm1, %vm187_vm2 }
  0xae   :  { %v184_v44 = vmul.f32 %v1121_v0, %v183_v35  ;;  %v206_v15 = vand.u32 2147483648, %v1585_v60  ;;  %vm1673_vm4 = vcmp.eq.f32.partialorder %v190_v20, 8.507059e+37  ;;  %vm201_vm5 = vweird.f32 %v1123_v28 }
  0xaf   :  { %v1127_v12 = vpop.eup %1126  ;;  %v198_v13 = vmul.f32 %v1123_v28, %v197_v43  ;;  %v210_v5 = vmul.f32 %v1125_v47, %v1596_v17  ;;  %v193_v34 = vor.u32 1.1754944e-38, %v192_v22  ;;  %vm1680_vm6 = vcmp.eq.f32.partialorder %v204_v23, 8.507059e+37  ;;  %vm202_vm10 = vmor %vm200_vm3, %vm201_vm5 }
  0xb0   :  { %v1678_v61 = vpop.eup %1128  ;;  %v185_v16 = vadd.f32 %v1121_v0, %v184_v44  ;;  %vm214_vm7 = vweird.f32 %v1596_v17  ;;  %v207_v52 = vor.u32 1.1754944e-38, %v206_v15  ;;  %vm215_vm9 = vweird.f32 %v1125_v47 }
  0xb1   :  { %v1685_v3 = vpop.eup %1130  ;;  %v199_v62 = vadd.f32 %v1123_v28, %v198_v13  ;;  %v211_v10 = vsub.f32 1.0, %v210_v5  ;;  %v218_v19 = vand.u32 2147483647, %v1596_v17  ;;  %v220_v59 = vand.u32 2147483648, %v1596_v17  ;;  %vm216_vm14 = vmor %vm214_vm7, %vm215_vm9 }
  0xb2   :  { %v1690_v50 = vpop.eup %1132  ;;  %v189_v57 = vsel %vm188_vm8, %v1121_v0, %v185_v16  ;;  %v224_v20 = vmul.f32 %v1127_v12, %v1619_v25  ;;  %vm228_vm11 = vweird.f32 %v1619_v25  ;;  %vm229_vm13 = vweird.f32 %v1127_v12 }
  0xb3   :  { %v1698_v53 = vpop.eup %1134  ;;  %v1702_v11 = vsel %vm1673_vm4, %v193_v34, %v189_v57  ;;  %v203_v35 = vsel %vm202_vm10, %v1123_v28, %v199_v62  ;;  %v212_v22 = vmul.f32 %v1125_v47, %v211_v10  ;;  %vm1709_vm12 = vcmp.eq.f32.partialorder %v218_v19, 8.507059e+37  ;;  %vm230_vm2 = vmor %vm228_vm11, %vm229_vm13 }
  0xb4   :  { %v1707_v60 = vsel %vm1680_vm6, %v207_v52, %v203_v35  ;;  %v221_v43 = vor.u32 1.1754944e-38, %v220_v59  ;;  %v225_v44 = vsub.f32 1.0, %v224_v20  ;;  %v232_v15 = vand.u32 2147483647, %v1619_v25 }
  0xb5   :  { %v213_v23 = vadd.f32 %v1125_v47, %v212_v22  ;;  %v234_v51 = vand.u32 2147483648, %v1619_v25  ;;  %v238_v13 = vmul.f32 %v1678_v61, %v1624_v24  ;;  %vm242_vm15 = vweird.f32 %v1624_v24 }
  0xb6   :  { %v226_v28 = vmul.f32 %v1127_v12, %v225_v44  ;;  %vm243_vm0 = vweird.f32 %v1678_v61  ;;  %vm1722_vm1 = vcmp.eq.f32.partialorder %v232_v15, 8.507059e+37  ;;  %v246_v40 = vand.u32 2147483647, %v1624_v24 }
  0xb7   :  { %v217_v5 = vsel %vm216_vm14, %v1125_v47, %v213_v23  ;;  %v235_v34 = vor.u32 1.1754944e-38, %v234_v51  ;;  %v239_v52 = vsub.f32 1.0, %v238_v13  ;;  %v248_v10 = vand.u32 2147483648, %v1624_v24 }
  0xb8   :  { %v222_v17 = vsel %vm1709_vm12, %v221_v43, %v217_v5  ;;  %v227_v62 = vadd.f32 %v1127_v12, %v226_v28  ;;  %vm1733_vm3 = vcmp.eq.f32.partialorder %v246_v40, 8.507059e+37  ;;  %v252_v57 = vmul.f32 %v1685_v3, %v1635_v49 }
  0xb9   :  { %vm256_vm4 = vweird.f32 %v1635_v49  ;;  %vm257_vm5 = vweird.f32 %v1685_v3  ;;  %v240_v59 = vmul.f32 %v1678_v61, %v239_v52  ;;  %v249_v20 = vor.u32 1.1754944e-38, %v248_v10 }
  0xba   :  { %v231_v19 = vsel %vm230_vm2, %v1127_v12, %v227_v62  ;;  %v260_v35 = vand.u32 2147483647, %v1635_v49  ;;  %v253_v22 = vsub.f32 1.0, %v252_v57  ;;  %v262_v0 = vand.u32 2147483648, %v1635_v49 }
  0xbb   :  { %v236_v25 = vsel %vm1722_vm1, %v235_v34, %v231_v19  ;;  %v266_v43 = vmul.f32 %v1690_v50, %v1641_v21  ;;  %vm173_vm6 = vcmp.gt.f32.partialorder %v1536_v2, 0.0  ;;  %vm174_vm7 = vcmp.gt.f32.partialorder %v1539_v6, 0.0  ;;  %vm244_vm1 = vmor %vm242_vm15, %vm243_vm0 }
  0xbc   :  { %vm175_vm8 = vcmp.gt.f32.partialorder %v1544_v33, 0.0  ;;  %v241_v12 = vadd.f32 %v1678_v61, %v240_v59  ;;  %vm1752_vm9 = vcmp.eq.f32.partialorder %v260_v35, 8.507059e+37  ;;  %vm270_vm10 = vweird.f32 %v1641_v21  ;;  %vm258_vm0 = vmor %vm256_vm4, %vm257_vm5 }
  0xbd   :  { %vm271_vm11 = vweird.f32 %v1690_v50  ;;  %vm176_vm12 = vcmp.gt.f32.partialorder %v1553_v9, 0.0  ;;  %vm177_vm13 = vcmp.gt.f32.partialorder %v1556_v56, 0.0  ;;  %v254_v23 = vmul.f32 %v1685_v3, %v253_v22 }
  0xbe   :  { %v263_v15 = vor.u32 1.1754944e-38, %v262_v0  ;;  %v267_v51 = vsub.f32 1.0, %v266_v43  ;;  %v274_v28 = vand.u32 2147483647, %v1641_v21  ;;  %vm179_vm2 = vcmp.gt.f32.partialorder %v1563_v32, 0.0  ;;  %vm272_vm4 = vmor %vm270_vm10, %vm271_vm11 }
  0xbf   :  { %v245_v13 = vsel %vm244_vm1, %v1678_v61, %v241_v12  ;;  %v276_v5 = vand.u32 2147483648, %v1641_v21  ;;  %v280_v16 = vmul.f32 %v1698_v53, %v1646_v29  ;;  %vm284_vm14 = vweird.f32 %v1646_v29 }
  0xc0   :  { %v250_v24 = vsel %vm1733_vm3, %v249_v20, %v245_v13  ;;  %v255_v34 = vadd.f32 %v1685_v3, %v254_v23  ;;  %v268_v40 = vmul.f32 %v1690_v50, %v267_v51  ;;  %vm1777_vm15 = vcmp.eq.f32.partialorder %v274_v28, 8.507059e+37 }
  0xc1   :  { %v277_v61 = vor.u32 1.1754944e-38, %v276_v5  ;;  %v281_v52 = vsub.f32 1.0, %v280_v16  ;;  %vm285_vm1 = vweird.f32 %v1698_v53  ;;  %v288_v10 = vand.u32 2147483647, %v1646_v29 }
  0xc2   :  { %vm180_vm3 = vcmp.gt.f32.partialorder %v1592_v8, 0.0  ;;  %v259_v47 = vsel %vm258_vm0, %v1685_v3, %v255_v34  ;;  %v269_v57 = vadd.f32 %v1690_v50, %v268_v40  ;;  %v290_v19 = vand.u32 2147483648, %v1646_v29 }
  0xc3   :  { %v293_v59 = vmul.f32 %v1702_v11, %v1536_v2  ;;  %v264_v49 = vsel %vm1752_vm9, %v263_v15, %v259_v47  ;;  %v282_v20 = vmul.f32 %v1698_v53, %v281_v52  ;;  %vm1800_vm5 = vcmp.eq.f32.partialorder %v288_v10, 8.507059e+37  ;;  %vm286_vm9 = vmor %vm284_vm14, %vm285_vm1 }
  0xc4   :  { %v294_v3 = vmul.f32 %v1707_v60, %v1539_v6  ;;  %v273_v22 = vsel %vm272_vm4, %v1690_v50, %v269_v57  ;;  %v291_v11 = vor.u32 1.1754944e-38, %v290_v19  ;;  %v295_v0 = vmul.f32 %v222_v17, %v1544_v33 }
  0xc5   :  { %v296_v43 = vmul.f32 %v236_v25, %v1553_v9  ;;  %v278_v21 = vsel %vm1777_vm15, %v277_v61, %v273_v22  ;;  %v283_v12 = vadd.f32 %v1698_v53, %v282_v20  ;;  %v297_v44 = vmul.f32 %v250_v24, %v1556_v56 }
  0xc6   :  { %v298_v23 = vmul.f32 %v264_v49, %v1559_v45  ;;  %v299_v50 = vmul.f32 %v278_v21, %v1563_v32  ;;  %v1821_v60 = vsel %vm173_vm6, %v293_v59, 0.0  ;;  %v1825_v17 = vsel %vm174_vm7, %v294_v3, 0.0 }
  0xc7   :  { %v1829_v25 = vsel %vm175_vm8, %v295_v0, 0.0  ;;  %v287_v15 = vsel %vm286_vm9, %v1698_v53, %v283_v12  ;;  %v1834_v29 = vsel %vm176_vm12, %v296_v43, 0.0  ;;  %v1838_v51 = vsel %vm177_vm13, %v297_v44, 0.0  ;;  %309 = vst [vmem:[#allocation2] sm:$0xff] %v1821_v60 }
  0xc8   :  { %vm2552_vm6 = vcmp.gt.f32.partialorder %v1559_v45, 0.0  ;;  %v292_v6 = vsel %vm1800_vm5, %v291_v11, %v287_v15  ;;  %v1849_v33 = vsel %vm179_vm2, %v299_v50, 0.0  ;;  %310 = vst [vmem:[#allocation2 + $0x8] sm:$0xff] %v1825_v17  ;;  %v317_v9 = vrot.slane %v1821_v60, 4 }
  0xc9   :  { %v1842_v2 = vsel %vm2552_vm6, %v298_v23, 0.0  ;;  %v323_v56 = vrot.slane %v1825_v17, 4  ;;  %v300_v53 = vmul.f32 %v292_v6, %v1592_v8  ;;  %311 = vst [vmem:[#allocation2 + $0x10] sm:$0xff] %v1829_v25  ;;  %v329_v45 = vrot.slane %v1829_v25, 4 }
  0xca   :  { %v335_v28 = vrot.slane %v1834_v29, 4  ;;  %v341_v13 = vrot.slane %v1838_v51, 4  ;;  %312 = vst [vmem:[#allocation2 + $0x18] sm:$0xff] %v1834_v29  ;;  %v318_v32 = vmax.f32 %v1821_v60, %v317_v9  ;;  %v347_v16 = vrot.slane %v1842_v2, 4 }
  0xcb   :  { %v324_v5 = vmax.f32 %v1825_v17, %v323_v56  ;;  %v353_v24 = vrot.slane %v1849_v33, 4  ;;  %v1866_v34 = vsel %vm180_vm3, %v300_v53, 0.0  ;;  %313 = vst [vmem:[#allocation2 + $0x20] sm:$0xff] %v1838_v51  ;;  %v330_v40 = vmax.f32 %v1829_v25, %v329_v45 }
  0xcc   :  { %v336_v62 = vmax.f32 %v1834_v29, %v335_v28  ;;  %v342_v61 = vmax.f32 %v1838_v51, %v341_v13  ;;  %314 = vst [vmem:[#allocation2 + $0x28] sm:$0xff] %v1842_v2  ;;  %v319_v52 = vrot.slane %v318_v32, 2  ;;  %v348_v47 = vmax.f32 %v1842_v2, %v347_v16 }
  0xcd   :  { %v325_v10 = vrot.slane %v324_v5, 2  ;;  %v354_v57 = vmax.f32 %v1849_v33, %v353_v24  ;;  %315 = vst [vmem:[#allocation2 + $0x30] sm:$0xff] %v1849_v33  ;;  %v331_v8 = vrot.slane %v330_v40, 2  ;;  %v359_v49 = vrot.slane %v1866_v34, 4 }
  0xce   :  { %v337_v19 = vrot.slane %v336_v62, 2  ;;  %v343_v59 = vrot.slane %v342_v61, 2  ;;  %316 = vst [vmem:[#allocation2 + $0x38] sm:$0xff] %v1866_v34  ;;  %v320_v20 = vmax.f32 %v318_v32, %v319_v52  ;;  %v349_v3 = vrot.slane %v348_v47, 2 }
  0xcf   :  { %v326_v35 = vmax.f32 %v324_v5, %v325_v10  ;;  %v355_v22 = vrot.slane %v354_v57, 2  ;;  %v332_v11 = vmax.f32 %v330_v40, %v331_v8  ;;  %v360_v21 = vmax.f32 %v1866_v34, %v359_v49 }
  0xd0   :  { %v338_v0 = vmax.f32 %v336_v62, %v337_v19  ;;  %v344_v43 = vmax.f32 %v342_v61, %v343_v59  ;;  %v683_v12 = vadd.f32 %v675_v26, %v1550_v1  ;;  %v684_v44 = vadd.f32 %v676_v42, %v1550_v1 }
  0xd1   :  { %v350_v23 = vmax.f32 %v348_v47, %v349_v3  ;;  %v356_v50 = vmax.f32 %v354_v57, %v355_v22  ;;  %v685_v15 = vadd.f32 %v677_v27, %v1550_v1  ;;  %v1890_v6 = vsub.f32 %v1651_v30, %v1602_v18 }
  0xd2   :  { %v321_v9 = vrot.slane %v320_v20, 1  ;;  %v361_v56 = vrot.slane %v360_v21, 2  ;;  %v1894_v31 = vsub.f32 %v1654_v58, %v1605_v14  ;;  %v327_v26 = vrot.slane %v326_v35, 1 }
  0xd3   :  { %v333_v53 = vrot.slane %v332_v11, 1  ;;  %v339_v36 = vrot.slane %v338_v0, 1  ;;  %v1898_v42 = vsub.f32 %v1659_v54, %v1608_v48  ;;  %v345_v45 = vrot.slane %v344_v43, 1 }
  0xd4   :  { %v351_v37 = vrot.slane %v350_v23, 1  ;;  %v357_v27 = vrot.slane %v356_v50, 1  ;;  %v686_v30 = vadd.f32 %v678_v39, %v1550_v1  ;;  %v1905_v28 = vsub.f32 %v1665_v7, %v1612_v55 }
  0xd5   :  { %v1908_v58 = vsub.f32 %v683_v12, %v1615_v4  ;;  %v1911_v13 = vsub.f32 %v684_v44, %v1628_v41  ;;  %v1914_v54 = vsub.f32 %v685_v15, %v1631_v63  ;;  %1136 = vrcp.f32 %v1890_v6 }
  0xd6   :  { %v1917_v32 = vmax.f32 %v320_v20, %v321_v9  ;;  %v362_v5 = vmax.f32 %v360_v21, %v361_v56  ;;  %1138 = vrcp.f32 %v1894_v31  ;;  %v1920_v38 = vmax.f32 %v326_v35, %v327_v26 }
  0xd7   :  { %v1922_v1 = vmax.f32 %v332_v11, %v333_v53  ;;  %v1924_v39 = vmax.f32 %v338_v0, %v339_v36  ;;  %1140 = vrcp.f32 %v1898_v42  ;;  %v1927_v7 = vmax.f32 %v344_v43, %v345_v45 }
  0xd8   :  { %v1929_v16 = vmax.f32 %v350_v23, %v351_v37  ;;  %v1931_v24 = vmax.f32 %v356_v50, %v357_v27  ;;  %v1934_v40 = vsub.f32 %v686_v30, %v1541_v46  ;;  %1142 = vrcp.f32 %v1905_v28 }
  0xd9   :  { %1144 = vrcp.f32 %v1908_v58  ;;  %v363_v62 = vrot.slane %v362_v5, 1  ;;  %vm2478_vm7 = vcmp.ge.f32.partialorder %v1917_v32, 0.5  ;;  %vm2477_vm8 = vcmp.ge.f32.partialorder %v1920_v38, 0.5 }
  0xda   :  { %1146 = vrcp.f32 %v1911_v13  ;;  %vm2476_vm10 = vcmp.ge.f32.partialorder %v1922_v1, 0.5  ;;  %vm2475_vm11 = vcmp.ge.f32.partialorder %v1924_v39, 0.5  ;;  %vm2474_vm12 = vcmp.ge.f32.partialorder %v1927_v7, 0.5 }
  0xdb   :  { %v1137_v61 = vpop.eup %1136  ;;  %1148 = vrcp.f32 %v1914_v54  ;;  %vm2473_vm13 = vcmp.ge.f32.partialorder %v1929_v16, 0.5  ;;  %vm2472_vm14 = vcmp.ge.f32.partialorder %v1931_v24, 0.5  ;;  %v2553_v10 = vmov 0  }
  0xdc   :  { %v1139_v52 = vpop.eup %1138  ;;  %1150 = vrcp.f32 %v1934_v40  ;;  %v1951_v47 = vsel %vm2478_vm7, 1, %v2553_v10  ;;  %v1955_v8 = vmax.f32 %v362_v5, %v363_v62  ;;  %v1960_v19 = vsel %vm2477_vm8, 1, %v2553_v10 }
  0xdd   :  { %v1953_v57 = vpop.eup %1140  ;;  %v1965_v59 = vsel %vm2476_vm10, 1, %v2553_v10  ;;  %v1970_v49 = vsel %vm2475_vm11, 1, %v2553_v10  ;;  %v1977_v35 = vsel %vm2474_vm12, 1, %v2553_v10  ;;  %v1982_v3 = vsel %vm2473_vm13, 1, %v2553_v10 }
  0xde   :  { %v1972_v20 = vpop.eup %1142  ;;  %2554 = vst [vmem:[#allocation5_spill] sm:$0xff] %v1982_v3  ;;  %v1987_v22 = vsel %vm2472_vm14, 1, %v2553_v10  ;;  %v704_v11 = vmul.f32 %v1137_v61, %v1890_v6  ;;  %vm708_vm2 = vweird.f32 %v1890_v6  ;;  %vm709_vm15 = vweird.f32 %v1137_v61 }
  0xdf   :  { %2555 = vst [vmem:[#allocation6_spill] sm:$0xff] %v1987_v22  ;;  %v1990_v0 = vpop.eup %1144  ;;  %v712_v43 = vand.u32 2147483647, %v1890_v6  ;;  %v714_v21 = vand.u32 2147483648, %v1890_v6  ;;  %v718_v23 = vmul.f32 %v1139_v52, %v1894_v31  ;;  %vm722_vm0 = vweird.f32 %v1894_v31  ;;  %vm710_vm6 = vmor %vm708_vm2, %vm709_vm15 }
  0xe0   :  { %v1995_v12 = vpop.eup %1146  ;;  %v705_v44 = vsub.f32 1.0, %v704_v11  ;;  %vm723_vm1 = vweird.f32 %v1139_v52  ;;  %v726_v56 = vand.u32 2147483647, %v1894_v31  ;;  %v728_v26 = vand.u32 2147483648, %v1894_v31 }
  0xe1   :  { %v1999_v50 = vpop.eup %1148  ;;  %vm2001_vm3 = vcmp.eq.f32.partialorder %v712_v43, 8.507059e+37  ;;  %v715_v9 = vor.u32 1.1754944e-38, %v714_v21  ;;  %v719_v45 = vsub.f32 1.0, %v718_v23  ;;  %v732_v37 = vmul.f32 %v1953_v57, %v1898_v42  ;;  %vm724_vm2 = vmor %vm722_vm0, %vm723_vm1 }
  0xe2   :  { %v2007_v53 = vpop.eup %1150  ;;  %v706_v36 = vmul.f32 %v1137_v61, %v705_v44  ;;  %vm736_vm4 = vweird.f32 %v1898_v42  ;;  %vm2012_vm5 = vcmp.eq.f32.partialorder %v726_v56, 8.507059e+37  ;;  %v729_v30 = vor.u32 1.1754944e-38, %v728_v26 }
  0xe3   :  { %vm737_vm9 = vweird.f32 %v1953_v57  ;;  %v740_v5 = vand.u32 2147483647, %v1898_v42  ;;  %v720_v11 = vmul.f32 %v1139_v52, %v719_v45  ;;  %v733_v43 = vsub.f32 1.0, %v732_v37 }
  0xe4   :  { %v707_v62 = vadd.f32 %v1137_v61, %v706_v36  ;;  %v742_v21 = vand.u32 2147483648, %v1898_v42  ;;  %v746_v23 = vmul.f32 %v1972_v20, %v1905_v28  ;;  %vm750_vm13 = vweird.f32 %v1905_v28  ;;  %vm738_vm0 = vmor %vm736_vm4, %vm737_vm9 }
  0xe5   :  { %vm2022_vm14 = vcmp.eq.f32.partialorder %v740_v5, 8.507059e+37  ;;  %vm751_vm12 = vweird.f32 %v1972_v20  ;;  %v721_v26 = vadd.f32 %v1139_v52, %v720_v11  ;;  %v734_v36 = vmul.f32 %v1953_v57, %v733_v43 }
  0xe6   :  { %v711_v56 = vsel %vm710_vm6, %v1137_v61, %v707_v62  ;;  %v743_v45 = vor.u32 1.1754944e-38, %v742_v21  ;;  %v747_v37 = vsub.f32 1.0, %v746_v23  ;;  %v754_v5 = vand.u32 2147483647, %v1905_v28  ;;  %vm752_vm4 = vmor %vm750_vm13, %vm751_vm12 }
  0xe7   :  { %v2033_v6 = vsel %vm2001_vm3, %v715_v9, %v711_v56  ;;  %v756_v22 = vand.u32 2147483648, %v1905_v28  ;;  %v725_v3 = vsel %vm724_vm2, %v1139_v52, %v721_v26  ;;  %v735_v61 = vadd.f32 %v1953_v57, %v734_v36 }
  0xe8   :  { %v760_v62 = vmul.f32 %v1990_v0, %v1908_v58  ;;  %vm764_vm15 = vweird.f32 %v1908_v58  ;;  %v2046_v15 = vsel %vm2012_vm5, %v729_v30, %v725_v3  ;;  %v748_v31 = vmul.f32 %v1972_v20, %v747_v37 }
  0xe9   :  { %vm2053_vm1 = vcmp.eq.f32.partialorder %v754_v5, 8.507059e+37  ;;  %v757_v9 = vor.u32 1.1754944e-38, %v756_v22  ;;  %v739_v11 = vsel %vm738_vm0, %v1953_v57, %v735_v61  ;;  %vm765_vm3 = vweird.f32 %v1990_v0 }
  0xea   :  { %v761_v43 = vsub.f32 1.0, %v760_v62  ;;  %v768_v3 = vand.u32 2147483647, %v1908_v58  ;;  %v744_v27 = vsel %vm2022_vm14, %v743_v45, %v739_v11  ;;  %v749_v42 = vadd.f32 %v1972_v20, %v748_v31  ;;  %vm766_vm0 = vmor %vm764_vm15, %vm765_vm3 }
  0xeb   :  { %v770_v30 = vand.u32 2147483648, %v1908_v58  ;;  %v774_v21 = vmul.f32 %v1995_v12, %v1911_v13  ;;  %vm778_vm14 = vweird.f32 %v1911_v13  ;;  %vm779_vm9 = vweird.f32 %v1995_v12 }
  0xec   :  { %v762_v57 = vmul.f32 %v1990_v0, %v761_v43  ;;  %vm2071_vm5 = vcmp.eq.f32.partialorder %v768_v3, 8.507059e+37  ;;  %v753_v44 = vsel %vm752_vm4, %v1972_v20, %v749_v42  ;;  %v782_v26 = vand.u32 2147483647, %v1911_v13  ;;  %vm780_vm3 = vmor %vm778_vm14, %vm779_vm9 }
  0xed   :  { %v771_v23 = vor.u32 1.1754944e-38, %v770_v30  ;;  %v775_v56 = vsub.f32 1.0, %v774_v21  ;;  %vm695_vm6 = vcmp.gt.f32.partialorder %v1602_v18, 0.0  ;;  %v758_v28 = vsel %vm2053_vm1, %v757_v9, %v753_v44 }
  0xee   :  { %v763_v36 = vadd.f32 %v1990_v0, %v762_v57  ;;  %v784_v45 = vand.u32 2147483648, %v1911_v13  ;;  %v788_v37 = vmul.f32 %v1999_v50, %v1914_v54  ;;  %vm696_vm12 = vcmp.gt.f32.partialorder %v1605_v14, 0.0 }
  0xef   :  { %vm697_vm13 = vcmp.gt.f32.partialorder %v1608_v48, 0.0  ;;  %vm698_vm2 = vcmp.gt.f32.partialorder %v1612_v55, 0.0  ;;  %v776_v20 = vmul.f32 %v1995_v12, %v775_v56  ;;  %vm2094_vm1 = vcmp.eq.f32.partialorder %v782_v26, 8.507059e+37 }
  0xf0   :  { %vm792_vm4 = vweird.f32 %v1914_v54  ;;  %vm793_vm11 = vweird.f32 %v1999_v50  ;;  %vm699_vm10 = vcmp.gt.f32.partialorder %v1615_v4, 0.0  ;;  %vm700_vm8 = vcmp.gt.f32.partialorder %v1628_v41, 0.0 }
  0xf1   :  { %v767_v61 = vsel %vm766_vm0, %v1990_v0, %v763_v36  ;;  %v785_v62 = vor.u32 1.1754944e-38, %v784_v45  ;;  %v789_v31 = vsub.f32 1.0, %v788_v37  ;;  %v796_v58 = vand.u32 2147483647, %v1914_v54  ;;  %vm794_vm14 = vmor %vm792_vm4, %vm793_vm11 }
  0xf2   :  { %v772_v52 = vsel %vm2071_vm5, %v771_v23, %v767_v61  ;;  %v777_v9 = vadd.f32 %v1995_v12, %v776_v20  ;;  %v798_v11 = vand.u32 2147483648, %v1914_v54  ;;  %v802_v43 = vmul.f32 %v2007_v53, %v1934_v40 }
  0xf3   :  { %v790_v0 = vmul.f32 %v1999_v50, %v789_v31  ;;  %vm2116_vm0 = vcmp.eq.f32.partialorder %v796_v58, 8.507059e+37  ;;  %vm806_vm5 = vweird.f32 %v1934_v40  ;;  %vm807_vm7 = vweird.f32 %v2007_v53 }
  0xf4   :  { %v781_v42 = vsel %vm780_vm3, %v1995_v12, %v777_v9  ;;  %v799_v30 = vor.u32 1.1754944e-38, %v798_v11  ;;  %v803_v21 = vsub.f32 1.0, %v802_v43  ;;  %v810_v57 = vand.u32 2147483647, %v1934_v40  ;;  %vm808_vm11 = vmor %vm806_vm5, %vm807_vm7 }
  0xf5   :  { %vm702_vm15 = vcmp.gt.f32.partialorder %v1541_v46, 0.0  ;;  %v786_v13 = vsel %vm2094_vm1, %v785_v62, %v781_v42  ;;  %v791_v22 = vadd.f32 %v1999_v50, %v790_v0  ;;  %v812_v44 = vand.u32 2147483648, %v1934_v40 }
  0xf6   :  { %v815_v23 = vmul.f32 %v2033_v6, %v1602_v18  ;;  %v804_v12 = vmul.f32 %v2007_v53, %v803_v21  ;;  %vm2136_vm9 = vcmp.eq.f32.partialorder %v810_v57, 8.507059e+37  ;;  %v816_v26 = vmul.f32 %v2046_v15, %v1605_v14 }
  0xf7   :  { %v817_v36 = vmul.f32 %v744_v27, %v1608_v48  ;;  %v795_v45 = vsel %vm794_vm14, %v1999_v50, %v791_v22  ;;  %v813_v37 = vor.u32 1.1754944e-38, %v812_v44  ;;  %v818_v6 = vmul.f32 %v758_v28, %v1612_v55 }
  0xf8   :  { %v819_v20 = vmul.f32 %v772_v52, %v1615_v4  ;;  %v800_v54 = vsel %vm2116_vm0, %v799_v30, %v795_v45  ;;  %v805_v5 = vadd.f32 %v2007_v53, %v804_v12  ;;  %v820_v61 = vmul.f32 %v786_v13, %v1628_v41 }
  0xf9   :  { %v2152_v62 = vsel %vm695_vm6, %v815_v23, 0.0  ;;  %v821_v50 = vmul.f32 %v800_v54, %v1631_v63  ;;  %v2161_v15 = vsel %vm696_vm12, %v816_v26, 0.0  ;;  %v2165_v27 = vsel %vm697_vm13, %v817_v36, 0.0 }
  0xfa   :  { %v2169_v18 = vsel %vm698_vm2, %v818_v6, 0.0  ;;  %832 = vst [vmem:[#allocation2 + $0x40] sm:$0xff] %v2152_v62  ;;  %v809_v28 = vsel %vm808_vm11, %v2007_v53, %v805_v5  ;;  %v2175_v40 = vsel %vm699_vm10, %v819_v20, 0.0  ;;  %v2179_v14 = vsel %vm700_vm8, %v820_v61, 0.0 }
  0xfb   :  { %833 = vst [vmem:[#allocation2 + $0x48] sm:$0xff] %v2161_v15  ;;  %v840_v48 = vrot.slane %v2152_v62, 4  ;;  %v814_v55 = vsel %vm2136_vm9, %v813_v37, %v809_v28  ;;  %vm2572_vm7 = vcmp.gt.f32.partialorder %v1631_v63, 0.0  ;;  %v846_v4 = vrot.slane %v2161_v15, 4 }
  0xfc   :  { %v2187_v31 = vsel %vm2572_vm7, %v821_v50, 0.0  ;;  %834 = vst [vmem:[#allocation2 + $0x50] sm:$0xff] %v2165_v27  ;;  %v852_v53 = vrot.slane %v2165_v27, 4  ;;  %v822_v41 = vmul.f32 %v814_v55, %v1541_v46  ;;  %v858_v58 = vrot.slane %v2169_v18, 4 }
  0xfd   :  { %835 = vst [vmem:[#allocation2 + $0x58] sm:$0xff] %v2169_v18  ;;  %v841_v63 = vmax.f32 %v2152_v62, %v840_v48  ;;  %v864_v52 = vrot.slane %v2175_v40, 4  ;;  %v847_v9 = vmax.f32 %v2161_v15, %v846_v4  ;;  %v870_v43 = vrot.slane %v2179_v14, 4 }
  0xfe   :  { %836 = vst [vmem:[#allocation2 + $0x60] sm:$0xff] %v2175_v40  ;;  %v853_v11 = vmax.f32 %v2165_v27, %v852_v53  ;;  %v876_v0 = vrot.slane %v2187_v31, 4  ;;  %v2209_v3 = vsel %vm702_vm15, %v822_v41, 0.0  ;;  %v859_v30 = vmax.f32 %v2169_v18, %v858_v58 }
  0xff   :  { %837 = vst [vmem:[#allocation2 + $0x68] sm:$0xff] %v2179_v14  ;;  %v842_v42 = vrot.slane %v841_v63, 2  ;;  %v865_v21 = vmax.f32 %v2175_v40, %v864_v52  ;;  %v848_v57 = vrot.slane %v847_v9, 2  ;;  %v871_v22 = vmax.f32 %v2179_v14, %v870_v43 }
 0x100   :  { %838 = vst [vmem:[#allocation2 + $0x70] sm:$0xff] %v2187_v31  ;;  %v854_v13 = vrot.slane %v853_v11, 2  ;;  %v877_v44 = vmax.f32 %v2187_v31, %v876_v0  ;;  %v860_v23 = vrot.slane %v859_v30, 2  ;;  %v882_v56 = vrot.slane %v2209_v3, 4 }
 0x101   :  { %839 = vst [vmem:[#allocation2 + $0x78] sm:$0xff] %v2209_v3  ;;  %v843_v46 = vmax.f32 %v841_v63, %v842_v42  ;;  %v866_v12 = vrot.slane %v865_v21, 2  ;;  %v849_v26 = vmax.f32 %v847_v9, %v848_v57  ;;  %v872_v45 = vrot.slane %v871_v22, 2 }
 0x102   :  { %v855_v36 = vmax.f32 %v853_v11, %v854_v13  ;;  %v878_v37 = vrot.slane %v877_v44, 2  ;;  %1084 = dma.vmem_to_hbm [thread:$0]  %s1080_s17, 2048, %s1082_s20, [#allocation3]   ;;  %vm381_vm8 = vcmp.eq.f32.partialorder %v1821_v60, %v1917_v32  ;;  %v861_v20 = vmax.f32 %v859_v30, %v860_v23 }
 0x103   :  { %v844_v6 = vrot.slane %v843_v46, 1  ;;  %v867_v54 = vmax.f32 %v865_v21, %v866_v12  ;;  %v883_v5 = vmax.f32 %v2209_v3, %v882_v56  ;;  %v850_v61 = vrot.slane %v849_v26, 1 }
 0x104   :  { %v856_v50 = vrot.slane %v855_v36, 1  ;;  %v873_v28 = vmax.f32 %v871_v22, %v872_v45  ;;  %v879_v48 = vmax.f32 %v877_v44, %v878_v37  ;;  %v862_v4 = vrot.slane %v861_v20, 1  ;;  %v2260_v22 = vpop.permute.xlu2 %390 }
 0x105   :  { %v2223_v55 = vmax.f32 %v843_v46, %v844_v6  ;;  %v868_v53 = vrot.slane %v867_v54, 1  ;;  %v884_v41 = vrot.slane %v883_v5, 2  ;;  %v2225_v63 = vmax.f32 %v849_v26, %v850_v61 }
 0x106   :  { %v2227_v58 = vmax.f32 %v855_v36, %v856_v50  ;;  %v874_v52 = vrot.slane %v873_v28, 1  ;;  %v880_v9 = vrot.slane %v879_v48, 1  ;;  %vm382_vm10 = vcmp.eq.f32.partialorder %v1825_v17, %v1920_v38 }
 0x107   :  { %v2231_v11 = vmax.f32 %v861_v20, %v862_v4  ;;  %v2233_v43 = vmax.f32 %v867_v54, %v868_v53  ;;  %v885_v0 = vmax.f32 %v883_v5, %v884_v41  ;;  %vm372_vm6 = vcmp.ge.f32.partialorder %v1955_v8, 0.5 }
 0x108   :  { %vm383_vm12 = vcmp.eq.f32.partialorder %v1829_v25, %v1922_v1  ;;  %v2238_v42 = vmax.f32 %v873_v28, %v874_v52  ;;  %v2240_v30 = vmax.f32 %v879_v48, %v880_v9  ;;  %vm384_vm13 = vcmp.eq.f32.partialorder %v1834_v29, %v1924_v39 }
 0x109   :  { %vm385_vm2 = vcmp.eq.f32.partialorder %v1838_v51, %v1927_v7  ;;  %v886_v21 = vrot.slane %v885_v0, 1  ;;  %vm888_vm1 = vcmp.ge.f32.partialorder %v2223_v55, 0.5  ;;  %vm2484_vm4 = vcmp.ge.f32.partialorder %v2225_v63, 0.5 }
 0x10a   :  { %vm2479_vm15 = vcmp.ge.f32.partialorder %v2227_v58, 0.5  ;;  %vm2483_vm3 = vcmp.ge.f32.partialorder %v2231_v11, 0.5  ;;  %vm2482_vm0 = vcmp.ge.f32.partialorder %v2233_v43, 0.5  ;;  %v2254_v57 = vsel %vm372_vm6, 1, %v2553_v10 }
 0x10b   :  { %v2256_v13 = vmax.f32 %v885_v0, %v886_v21  ;;  %vm2481_vm5 = vcmp.ge.f32.partialorder %v2238_v42, 0.5  ;;  %vm2480_vm14 = vcmp.ge.f32.partialorder %v2240_v30, 0.5  ;;  %vm386_vm9 = vcmp.eq.f32.partialorder %v1842_v2, %v1929_v16 }
 0x10c   :  { %vm387_vm11 = vcmp.eq.f32.partialorder %v1849_v33, %v1931_v24  ;;  %vm388_vm7 = vcmp.eq.f32.partialorder %v1866_v34, %v1955_v8  ;;  %v2271_v44 = vsel %vm888_vm1, 1, %v2553_v10  ;;  %v2276_v46 = vsel %vm2484_vm4, 1, %v2553_v10 }
 0x10d   :  { %2573 = vst [vmem:[#allocation7_spill] sm:$0xff] %v2271_v44  ;;  %v2281_v23 = vsel %vm2479_vm15, 1, %v2553_v10  ;;  %v2286_v12 = vsel %vm2483_vm3, 1, %v2553_v10  ;;  %v2291_v56 = vsel %vm2482_vm0, 1, %v2553_v10  ;;  %v2296_v26 = vsel %vm2481_vm5, 1, %v2553_v10 }
 0x10e   :  { %2574 = vst [vmem:[#allocation8_spill] sm:$0xff] %v2281_v23  ;;  %v2301_v36 = vsel %vm2480_vm14, 1, %v2553_v10  ;;  %vm911_vm15 = vcmp.eq.f32.partialorder %v2209_v3, %v2256_v13  ;;  %v392_v45 = vsel %vm381_vm8, %v2260_v22, 128  ;;  %v393_v37 = vsel %vm382_vm10, %v2260_v22, 128 }
 0x10f   :  { %2575 = vst [vmem:[#allocation9_spill] sm:$0xff] %v2286_v12  ;;  %v394_v6 = vsel %vm383_vm12, %v2260_v22, 128  ;;  %v395_v20 = vsel %vm384_vm13, %v2260_v22, 128  ;;  %v396_v60 = vsel %vm385_vm2, %v2260_v22, 128  ;;  %v397_v17 = vsel %vm386_vm9, %v2260_v22, 128 }
 0x110   :  { %2576 = vst [vmem:[#allocation10_spill] sm:$0xff] %v2291_v56  ;;  %v398_v25 = vsel %vm387_vm11, %v2260_v22, 128  ;;  %v399_v29 = vsel %vm388_vm7, %v2260_v22, 128  ;;  %v400_v54 = vrot.slane %v392_v45, 4  ;;  %v409_v5 = vrot.slane %v393_v37, 4 }
 0x111   :  { %2577 = vst [vmem:[#allocation11_spill] sm:$0xff] %v2296_v26  ;;  %v418_v61 = vrot.slane %v394_v6, 4  ;;  %v427_v51 = vrot.slane %v395_v20, 4  ;;  %v436_v50 = vrot.slane %v396_v60, 4  ;;  %v445_v28 = vrot.slane %v397_v17, 4 }
 0x112   :  { %2578 = vst [vmem:[#allocation12_spill] sm:$0xff] %v2301_v36  ;;  %vm401_vm8 = vcmp.lt.s32.totalorder %v392_v45, %v400_v54  ;;  %v454_v48 = vrot.slane %v398_v25, 4  ;;  %v463_v2 = vrot.slane %v399_v29, 4  ;;  %vm410_vm10 = vcmp.lt.s32.totalorder %v393_v37, %v409_v5 }
 0x113   :  { %v402_v4 = vsel %vm401_vm8, %v392_v45, %v400_v54  ;;  %vm419_vm12 = vcmp.lt.s32.totalorder %v394_v6, %v418_v61  ;;  %vm428_vm13 = vcmp.lt.s32.totalorder %v395_v20, %v427_v51  ;;  %v411_v53 = vsel %vm410_vm10, %v393_v37, %v409_v5 }
 0x114   :  { %v403_v33 = vrot.slane %v402_v4, 2  ;;  %v420_v41 = vsel %vm419_vm12, %v394_v6, %v418_v61  ;;  %v429_v52 = vsel %vm428_vm13, %v395_v20, %v427_v51  ;;  %v412_v9 = vrot.slane %v411_v53, 2 }
 0x115   :  { %v421_v34 = vrot.slane %v420_v41, 2  ;;  %v430_v0 = vrot.slane %v429_v52, 2  ;;  %vm437_vm2 = vcmp.lt.s32.totalorder %v396_v60, %v436_v50  ;;  %vm446_vm11 = vcmp.lt.s32.totalorder %v397_v17, %v445_v28 }
 0x116   :  { %vm404_vm9 = vcmp.lt.s32.totalorder %v402_v4, %v403_v33  ;;  %v438_v21 = vsel %vm437_vm2, %v396_v60, %v436_v50  ;;  %vm455_vm7 = vcmp.lt.s32.totalorder %v398_v25, %v454_v48  ;;  %vm413_vm14 = vcmp.lt.s32.totalorder %v411_v53, %v412_v9 }
 0x117   :  { %v405_v44 = vsel %vm404_vm9, %v402_v4, %v403_v33  ;;  %vm422_vm5 = vcmp.lt.s32.totalorder %v420_v41, %v421_v34  ;;  %vm431_vm0 = vcmp.lt.s32.totalorder %v429_v52, %v430_v0  ;;  %v414_v54 = vsel %vm413_vm14, %v411_v53, %v412_v9 }
 0x118   :  { %v406_v45 = vrot.slane %v405_v44, 1  ;;  %v423_v36 = vsel %vm422_vm5, %v420_v41, %v421_v34  ;;  %v432_v26 = vsel %vm431_vm0, %v429_v52, %v430_v0  ;;  %v415_v56 = vrot.slane %v414_v54, 1 }
 0x119   :  { %v424_v37 = vrot.slane %v423_v36, 1  ;;  %v433_v6 = vrot.slane %v432_v26, 1  ;;  %v439_v20 = vrot.slane %v438_v21, 2  ;;  %v447_v5 = vsel %vm446_vm11, %v397_v17, %v445_v28 }
 0x11a   :  { %vm407_vm8 = vcmp.lt.s32.totalorder %v405_v44, %v406_v45  ;;  %v456_v61 = vsel %vm455_vm7, %v398_v25, %v454_v48  ;;  %vm464_vm10 = vcmp.lt.s32.totalorder %v399_v29, %v463_v2  ;;  %vm416_vm12 = vcmp.lt.s32.totalorder %v414_v54, %v415_v56 }
 0x11b   :  { %v408_v51 = vsel %vm407_vm8, %v405_v44, %v406_v45  ;;  %vm425_vm13 = vcmp.lt.s32.totalorder %v423_v36, %v424_v37  ;;  %vm434_vm2 = vcmp.lt.s32.totalorder %v432_v26, %v433_v6  ;;  %v417_v60 = vsel %vm416_vm12, %v414_v54, %v415_v56 }
 0x11c   :  { %v426_v50 = vsel %vm425_vm13, %v423_v36, %v424_v37  ;;  %v435_v4 = vsel %vm434_vm2, %v432_v26, %v433_v6  ;;  %vm440_vm9 = vcmp.lt.s32.totalorder %v438_v21, %v439_v20  ;;  %v448_v53 = vrot.slane %v447_v5, 2 }
 0x11d   :  { %v441_v33 = vsel %vm440_vm9, %v438_v21, %v439_v20  ;;  %v457_v41 = vrot.slane %v456_v61, 2  ;;  %v465_v52 = vsel %vm464_vm10, %v399_v29, %v463_v2  ;;  %v472_v0 = vshra.s32 %v408_v51, 4 }
 0x11e   :  { %v442_v9 = vrot.slane %v441_v33, 1  ;;  %v466_v34 = vrot.slane %v465_v52, 2  ;;  %v473_v12 = vshra.s32 %v417_v60, 4  ;;  %vm449_vm0 = vcmp.lt.s32.totalorder %v447_v5, %v448_v53 }
 0x11f   :  { %vm458_vm5 = vcmp.lt.s32.totalorder %v456_v61, %v457_v41  ;;  %v474_v17 = vshra.s32 %v426_v50, 4  ;;  %v475_v25 = vshra.s32 %v435_v4, 4  ;;  %v450_v44 = vsel %vm449_vm0, %v447_v5, %v448_v53 }
 0x120   :  { %vm443_vm14 = vcmp.lt.s32.totalorder %v441_v33, %v442_v9  ;;  %v459_v28 = vsel %vm458_vm5, %v456_v61, %v457_v41  ;;  %vm467_vm11 = vcmp.lt.s32.totalorder %v465_v52, %v466_v34  ;;  %v451_v36 = vrot.slane %v450_v44, 1 }
 0x121   :  { %v444_v56 = vsel %vm443_vm14, %v441_v33, %v442_v9  ;;  %v460_v26 = vrot.slane %v459_v28, 1  ;;  %v468_v48 = vsel %vm467_vm11, %v465_v52, %v466_v34  ;;  %v480_v54 = vand.u32 15, %v408_v51 }
 0x122   :  { %v469_v21 = vrot.slane %v468_v48, 1  ;;  %v476_v45 = vshra.s32 %v444_v56, 4  ;;  %v481_v29 = vand.u32 15, %v417_v60  ;;  %vm452_vm7 = vcmp.lt.s32.totalorder %v450_v44, %v451_v36 }
 0x123   :  { %vm461_vm8 = vcmp.lt.s32.totalorder %v459_v28, %v460_v26  ;;  %v482_v2 = vand.u32 15, %v426_v50  ;;  %v483_v37 = vand.u32 15, %v435_v4  ;;  %v453_v6 = vsel %vm452_vm7, %v450_v44, %v451_v36 }
 0x124   :  { %v462_v20 = vsel %vm461_vm8, %v459_v28, %v460_v26  ;;  %vm470_vm10 = vcmp.lt.s32.totalorder %v468_v48, %v469_v21  ;;  %v484_v23 = vand.u32 15, %v444_v56  ;;  %vm904_vm12 = vcmp.eq.f32.partialorder %v2152_v62, %v2223_v55 }
 0x125   :  { %v471_v5 = vsel %vm470_vm10, %v468_v48, %v469_v21  ;;  %v477_v61 = vshra.s32 %v453_v6, 4  ;;  %v478_v33 = vshra.s32 %v462_v20, 4  ;;  %v485_v53 = vand.u32 15, %v453_v6 }
 0x126   :  { %v479_v41 = vshra.s32 %v471_v5, 4  ;;  %v486_v52 = vand.u32 15, %v462_v20  ;;  %v487_v9 = vand.u32 15, %v471_v5  ;;  %vm2579_vm13 = vcmp.ge.f32.partialorder %v1917_v32, 0.5 }
 0x127   :  { %v496_v51 = vsel %vm2579_vm13, %v480_v54, 10  ;;  %vm905_vm2 = vcmp.eq.f32.partialorder %v2161_v15, %v2225_v63  ;;  %vm2580_vm9 = vcmp.ge.f32.partialorder %v1920_v38, 0.5  ;;  %vm2581_vm0 = vcmp.ge.f32.partialorder %v1922_v1, 0.5 }
 0x128   :  { %v497_v60 = vsel %vm2580_vm9, %v481_v29, 10  ;;  %v498_v50 = vsel %vm2581_vm0, %v482_v2, 10  ;;  %vm2582_vm5 = vcmp.ge.f32.partialorder %v1924_v39, 0.5  ;;  %vm2583_vm14 = vcmp.ge.f32.partialorder %v1927_v7, 0.5 }
 0x129   :  { %v499_v4 = vsel %vm2582_vm5, %v483_v37, 10  ;;  %v500_v34 = vsel %vm2583_vm14, %v484_v23, 10  ;;  %vm543_vm11 = vcmask 1040384   ;;  %vm545_vm7 = vcmask 1042434  }
 0x12a   :  { %vm906_vm8 = vcmp.eq.f32.partialorder %v2165_v27, %v2227_v58  ;;  %vm907_vm10 = vcmp.eq.f32.partialorder %v2169_v18, %v2231_v11  ;;  %vm2584_vm13 = vcmp.ge.f32.partialorder %v1929_v16, 0.5  ;;  %vm2585_vm9 = vcmp.ge.f32.partialorder %v1931_v24, 0.5 }
 0x12b   :  { %v501_v32 = vsel %vm2584_vm13, %v485_v53, 10  ;;  %v502_v38 = vsel %vm2585_vm9, %v486_v52, 10  ;;  %v503_v1 = vsel %vm372_vm6, %v487_v9, 10  ;;  %v504_v39 = vshll.u32 %v472_v0, 5  ;;  %v2586_v52 = vld [vmem:[#allocation5_spill] sm:$0xff] }
 0x12c   :  { %vm547_vm0 = vcmask 1041408   ;;  %vm549_vm5 = vcmask 1044484   ;;  %vm551_vm14 = vcmask 1046534   ;;  %vm908_vm3 = vcmp.eq.f32.partialorder %v2175_v40, %v2233_v43 }
 0x12d   :  { %v505_v7 = vshll.u32 %v473_v12, 5  ;;  %v506_v23 = vshll.u32 %v474_v17, 5  ;;  %v507_v44 = vshll.u32 %v475_v25, 5  ;;  %v508_v28 = vshll.u32 %v476_v45, 5 }
 0x12e   :  { %vm2486_vm4 = vcmask 1045508   ;;  %vm909_vm13 = vcmp.eq.f32.partialorder %v2179_v14, %v2238_v42  ;;  %vm910_vm9 = vcmp.eq.f32.partialorder %v2187_v31, %v2240_v30  ;;  %v509_v16 = vshll.u32 %v477_v61, 5 }
 0x12f   :  { %v510_v24 = vshll.u32 %v478_v33, 5  ;;  %v511_v8 = vshll.u32 %v479_v41, 5  ;;  %v512_v0 = vshll.u32 %v496_v51, 1  ;;  %vm2485_vm6 = vcmask 1043456   ;;  %v2587_v51 = vld [vmem:[#allocation6_spill] sm:$0xff] }
 0x130   :  { %v513_v56 = vshll.u32 %v497_v60, 1  ;;  %v514_v36 = vshll.u32 %v498_v50, 1  ;;  %v515_v26 = vshll.u32 %v499_v4, 1  ;;  %v516_v48 = vshll.u32 %v500_v34, 1 }
 0x131   :  { %v517_v12 = vshll.u32 %v501_v32, 1  ;;  %v518_v17 = vshll.u32 %v502_v38, 1  ;;  %v519_v25 = vshll.u32 %v503_v1, 1  ;;  %v520_v21 = vor.u32 %v512_v0, %v504_v39 }
 0x132   :  { %v521_v45 = vor.u32 %v513_v56, %v505_v7  ;;  %v522_v54 = vor.u32 %v514_v36, %v506_v23  ;;  %v523_v29 = vor.u32 %v515_v26, %v507_v44  ;;  %v524_v2 = vor.u32 %v516_v48, %v508_v28 }
 0x133   :  { %v525_v37 = vor.u32 %v517_v12, %v509_v16  ;;  %v526_v6 = vor.u32 %v518_v17, %v510_v24  ;;  %v527_v20 = vor.u32 %v519_v25, %v511_v8  ;;  %v528_v5 = vor.u32 %v520_v21, %v1951_v47 }
 0x134   :  { %v529_v61 = vor.u32 %v521_v45, %v1960_v19  ;;  %v530_v33 = vor.u32 %v522_v54, %v1965_v59  ;;  %v531_v53 = vor.u32 %v523_v29, %v1970_v49  ;;  %v532_v41 = vor.u32 %v524_v2, %v1977_v35 }
 0x135   :  { %v533_v9 = vor.u32 %v525_v37, %v2586_v52  ;;  %v534_v60 = vor.u32 %v526_v6, %v2587_v51  ;;  %v535_v50 = vor.u32 %v527_v20, %v2254_v57  ;;  %v912_v4 = vsel %vm904_vm12, %v2260_v22, 128 }
 0x136   :  { %v536_v47 = vrot.slane %v529_v61, 7  ;;  %v537_v34 = vrot.slane %v530_v33, 6  ;;  %v538_v19 = vrot.slane %v531_v53, 5  ;;  %v539_v32 = vrot.slane %v532_v41, 4 }
 0x137   :  { %v540_v59 = vrot.slane %v533_v9, 3  ;;  %v541_v38 = vrot.slane %v534_v60, 2  ;;  %v542_v49 = vrot.slane %v535_v50, 1  ;;  %v913_v35 = vsel %vm905_vm2, %v2260_v22, 128 }
 0x138   :  { %v544_v1 = vsel %vm543_vm11, %v528_v5, %v536_v47  ;;  %v546_v57 = vsel %vm545_vm7, %v537_v34, %v538_v19  ;;  %v914_v62 = vsel %vm906_vm8, %v2260_v22, 128  ;;  %v915_v39 = vsel %vm907_vm10, %v2260_v22, 128 }
 0x139   :  { %v548_v7 = vsel %vm547_vm0, %v544_v1, %v546_v57  ;;  %v550_v23 = vsel %vm549_vm5, %v539_v32, %v540_v59  ;;  %v552_v15 = vsel %vm551_vm14, %v541_v38, %v542_v49  ;;  %v916_v44 = vsel %vm908_vm3, %v2260_v22, 128 }
 0x13a   :  { %v554_v28 = vsel %vm2486_vm4, %v550_v23, %v552_v15  ;;  %v917_v27 = vsel %vm909_vm13, %v2260_v22, 128  ;;  %v918_v18 = vsel %vm910_vm9, %v2260_v22, 128  ;;  %v919_v16 = vsel %vm911_vm15, %v2260_v22, 128 }
 0x13b   :  { %v556_v40 = vsel %vm2485_vm6, %v548_v7, %v554_v28  ;;  %v920_v24 = vrot.slane %v912_v4, 4  ;;  %v929_v8 = vrot.slane %v913_v35, 4  ;;  %v938_v0 = vrot.slane %v914_v62, 4 }
 0x13c   :  { %557 = vst [vmem:[%s2468_s2] sm:$0xff] %v556_v40  ;;  %v947_v14 = vrot.slane %v915_v39, 4  ;;  %v956_v56 = vrot.slane %v916_v44, 4  ;;  %v965_v36 = vrot.slane %v917_v27, 4  ;;  %v974_v26 = vrot.slane %v918_v18, 4 }
 0x13d   :  { %vm921_vm3 = vcmp.lt.s32.totalorder %v912_v4, %v920_v24  ;;  %vm930_vm12 = vcmp.lt.s32.totalorder %v913_v35, %v929_v8  ;;  %vm939_vm2 = vcmp.lt.s32.totalorder %v914_v62, %v938_v0  ;;  %v983_v31 = vrot.slane %v919_v16, 4 }
 0x13e   :  { %v922_v48 = vsel %vm921_vm3, %v912_v4, %v920_v24  ;;  %v931_v3 = vsel %vm930_vm12, %v913_v35, %v929_v8  ;;  %v940_v22 = vsel %vm939_vm2, %v914_v62, %v938_v0  ;;  %vm948_vm15 = vcmp.lt.s32.totalorder %v915_v39, %v947_v14 }
 0x13f   :  { %v923_v12 = vrot.slane %v922_v48, 2  ;;  %v932_v17 = vrot.slane %v931_v3, 2  ;;  %v941_v25 = vrot.slane %v940_v22, 2  ;;  %v949_v21 = vsel %vm948_vm15, %v915_v39, %v947_v14 }
 0x140   :  { %v950_v45 = vrot.slane %v949_v21, 2  ;;  %vm957_vm8 = vcmp.lt.s32.totalorder %v916_v44, %v956_v56  ;;  %vm2417_vm10 = vcmp.lt.s32.totalorder %v917_v27, %v965_v36  ;;  %vm2421_vm13 = vcmp.lt.s32.totalorder %v918_v18, %v974_v26 }
 0x141   :  { %vm924_vm9 = vcmp.lt.s32.totalorder %v922_v48, %v923_v12  ;;  %vm933_vm6 = vcmp.lt.s32.totalorder %v931_v3, %v932_v17  ;;  %vm942_vm3 = vcmp.lt.s32.totalorder %v940_v22, %v941_v25  ;;  %v958_v2 = vsel %vm957_vm8, %v916_v44, %v956_v56 }
 0x142   :  { %v925_v37 = vsel %vm924_vm9, %v922_v48, %v923_v12  ;;  %v934_v6 = vsel %vm933_vm6, %v931_v3, %v932_v17  ;;  %v943_v20 = vsel %vm942_vm3, %v940_v22, %v941_v25  ;;  %vm951_vm12 = vcmp.lt.s32.totalorder %v949_v21, %v950_v45 }
 0x143   :  { %v926_v5 = vrot.slane %v925_v37, 1  ;;  %v935_v61 = vrot.slane %v934_v6, 1  ;;  %v944_v33 = vrot.slane %v943_v20, 1  ;;  %v952_v53 = vsel %vm951_vm12, %v949_v21, %v950_v45 }
 0x144   :  { %v953_v41 = vrot.slane %v952_v53, 1  ;;  %v959_v52 = vrot.slane %v958_v2, 2  ;;  %v967_v9 = vsel %vm2417_vm10, %v917_v27, %v965_v36  ;;  %v976_v51 = vsel %vm2421_vm13, %v918_v18, %v974_v26 }
 0x145   :  { %vm927_vm2 = vcmp.lt.s32.totalorder %v925_v37, %v926_v5  ;;  %vm936_vm15 = vcmp.lt.s32.totalorder %v934_v6, %v935_v61  ;;  %vm945_vm4 = vcmp.lt.s32.totalorder %v943_v20, %v944_v33  ;;  %v968_v60 = vrot.slane %v967_v9, 2 }
 0x146   :  { %v928_v50 = vsel %vm927_vm2, %v925_v37, %v926_v5  ;;  %v937_v4 = vsel %vm936_vm15, %v934_v6, %v935_v61  ;;  %v946_v47 = vsel %vm945_vm4, %v943_v20, %v944_v33  ;;  %vm954_vm6 = vcmp.lt.s32.totalorder %v952_v53, %v953_v41 }
 0x147   :  { %v955_v34 = vsel %vm954_vm6, %v952_v53, %v953_v41  ;;  %vm960_vm8 = vcmp.lt.s32.totalorder %v958_v2, %v959_v52  ;;  %vm969_vm9 = vcmp.lt.s32.totalorder %v967_v9, %v968_v60  ;;  %v977_v19 = vrot.slane %v976_v51, 2 }
 0x148   :  { %v961_v32 = vsel %vm960_vm8, %v958_v2, %v959_v52  ;;  %v970_v59 = vsel %vm969_vm9, %v967_v9, %v968_v60  ;;  %vm984_vm3 = vcmp.lt.s32.totalorder %v919_v16, %v983_v31  ;;  %v992_v38 = vshra.s32 %v928_v50, 4 }
 0x149   :  { %v962_v49 = vrot.slane %v961_v32, 1  ;;  %v971_v35 = vrot.slane %v970_v59, 1  ;;  %vm978_vm10 = vcmp.lt.s32.totalorder %v976_v51, %v977_v19  ;;  %v985_v1 = vsel %vm984_vm3, %v919_v16, %v983_v31 }
 0x14a   :  { %v979_v57 = vsel %vm978_vm10, %v976_v51, %v977_v19  ;;  %v986_v62 = vrot.slane %v985_v1, 2  ;;  %v993_v39 = vshra.s32 %v937_v4, 4  ;;  %v994_v7 = vshra.s32 %v946_v47, 4 }
 0x14b   :  { %vm895_vm13 = vcmp.ge.f32.partialorder %v2256_v13, 0.5  ;;  %vm963_vm4 = vcmp.lt.s32.totalorder %v961_v32, %v962_v49  ;;  %vm972_vm12 = vcmp.lt.s32.totalorder %v970_v59, %v971_v35  ;;  %v980_v23 = vrot.slane %v979_v57, 1 }
 0x14c   :  { %v995_v15 = vshra.s32 %v955_v34, 4  ;;  %v964_v44 = vsel %vm963_vm4, %v961_v32, %v962_v49  ;;  %v973_v28 = vsel %vm972_vm12, %v970_v59, %v971_v35  ;;  %vm987_vm2 = vcmp.lt.s32.totalorder %v985_v1, %v986_v62  ;;  %v2598_v49 = vld [vmem:[#allocation8_spill] sm:$0xff] }
 0x14d   :  { %v1000_v27 = vand.u32 15, %v928_v50  ;;  %vm981_vm15 = vcmp.lt.s32.totalorder %v979_v57, %v980_v23  ;;  %v988_v18 = vsel %vm987_vm2, %v985_v1, %v986_v62  ;;  %v996_v40 = vshra.s32 %v964_v44, 4  ;;  %v2599_v1 = vld [vmem:[#allocation9_spill] sm:$0xff]  ;;  %v2600_v62 = vld [vmem:[#allocation10_spill] sm:$0xff] }
 0x14e   :  { %v997_v24 = vshra.s32 %v973_v28, 4  ;;  %v982_v8 = vsel %vm981_vm15, %v979_v57, %v980_v23  ;;  %v989_v16 = vrot.slane %v988_v18, 1  ;;  %v1001_v0 = vand.u32 15, %v937_v4 }
 0x14f   :  { %v1002_v14 = vand.u32 15, %v946_v47  ;;  %v998_v56 = vshra.s32 %v982_v8, 4  ;;  %v1003_v36 = vand.u32 15, %v955_v34  ;;  %v1004_v26 = vand.u32 15, %v964_v44 }
 0x150   :  { %v1005_v31 = vand.u32 15, %v973_v28  ;;  %vm990_vm6 = vcmp.lt.s32.totalorder %v988_v18, %v989_v16  ;;  %v1006_v48 = vand.u32 15, %v982_v8  ;;  %v1016_v3 = vsel %vm888_vm1, %v1000_v27, 10  ;;  %v2603_v28 = vld [vmem:[#allocation7_spill] sm:$0xff] }
 0x151   :  { %vm2592_vm8 = vcmp.ge.f32.partialorder %v2225_v63, 0.5  ;;  %v991_v12 = vsel %vm990_vm6, %v988_v18, %v989_v16  ;;  %vm2593_vm9 = vcmp.ge.f32.partialorder %v2227_v58, 0.5  ;;  %vm2594_vm3 = vcmp.ge.f32.partialorder %v2231_v11, 0.5 }
 0x152   :  { %v1017_v22 = vsel %vm2592_vm8, %v1001_v0, 10  ;;  %v1018_v17 = vsel %vm2593_vm9, %v1002_v14, 10  ;;  %v1019_v25 = vsel %vm2594_vm3, %v1003_v36, 10  ;;  %vm2595_vm10 = vcmp.ge.f32.partialorder %v2233_v43, 0.5 }
 0x153   :  { %v1020_v21 = vsel %vm2595_vm10, %v1004_v26, 10  ;;  %v999_v45 = vshra.s32 %v991_v12, 4  ;;  %v1007_v54 = vand.u32 15, %v991_v12  ;;  %vm2596_vm4 = vcmp.ge.f32.partialorder %v2238_v42, 0.5 }
 0x154   :  { %v1021_v29 = vsel %vm2596_vm4, %v1005_v31, 10  ;;  %vm2597_vm1 = vcmp.ge.f32.partialorder %v2240_v30, 0.5  ;;  %v1024_v63 = vshll.u32 %v992_v38, 5  ;;  %v1025_v2 = vshll.u32 %v993_v39, 5 }
 0x155   :  { %v1022_v55 = vsel %vm2597_vm1, %v1006_v48, 10  ;;  %v1026_v37 = vshll.u32 %v994_v7, 5  ;;  %v1027_v6 = vshll.u32 %v995_v15, 5  ;;  %v1023_v58 = vsel %vm895_vm13, %v1007_v54, 10  ;;  %v2601_v7 = vld [vmem:[#allocation11_spill] sm:$0xff]  ;;  %v2602_v15 = vld [vmem:[#allocation12_spill] sm:$0xff] }
 0x156   :  { %v1028_v11 = vshll.u32 %v996_v40, 5  ;;  %v1029_v20 = vshll.u32 %v997_v24, 5  ;;  %v1030_v5 = vshll.u32 %v998_v56, 5  ;;  %v1031_v43 = vshll.u32 %v999_v45, 5 }
 0x157   :  { %v1032_v61 = vshll.u32 %v1016_v3, 1  ;;  %v1033_v33 = vshll.u32 %v1017_v22, 1  ;;  %v1034_v53 = vshll.u32 %v1018_v17, 1  ;;  %v1035_v41 = vshll.u32 %v1019_v25, 1 }
 0x158   :  { %v1036_v42 = vshll.u32 %v1020_v21, 1  ;;  %v1037_v52 = vshll.u32 %v1021_v29, 1  ;;  %v1038_v9 = vshll.u32 %v1022_v55, 1  ;;  %v1039_v30 = vshll.u32 %v1023_v58, 1 }
 0x159   :  { %v1040_v51 = vor.u32 %v1032_v61, %v1024_v63  ;;  %v1041_v60 = vor.u32 %v1033_v33, %v1025_v2  ;;  %v1042_v50 = vor.u32 %v1034_v53, %v1026_v37  ;;  %v1043_v4 = vor.u32 %v1035_v41, %v1027_v6 }
 0x15a   :  { %v1044_v47 = vor.u32 %v1036_v42, %v1028_v11  ;;  %v1045_v34 = vor.u32 %v1037_v52, %v1029_v20  ;;  %v1046_v19 = vor.u32 %v1038_v9, %v1030_v5  ;;  %v903_v32 = vsel %vm895_vm13, 1, %v2553_v10 }
 0x15b   :  { %v1047_v59 = vor.u32 %v1039_v30, %v1031_v43  ;;  %v1049_v38 = vor.u32 %v1041_v60, %v2276_v46  ;;  %v1050_v35 = vor.u32 %v1042_v50, %v2598_v49  ;;  %v1051_v57 = vor.u32 %v1043_v4, %v2599_v1 }
 0x15c   :  { %v1052_v39 = vor.u32 %v1044_v47, %v2600_v62  ;;  %v1053_v23 = vor.u32 %v1045_v34, %v2601_v7  ;;  %v1054_v44 = vor.u32 %v1046_v19, %v2602_v15  ;;  %v1048_v27 = vor.u32 %v1040_v51, %v2603_v28 }
 0x15d   :  { %v1055_v18 = vor.u32 %v1047_v59, %v903_v32  ;;  %v1056_v40 = vrot.slane %v1049_v38, 7  ;;  %v1057_v24 = vrot.slane %v1050_v35, 6  ;;  %v1058_v13 = vrot.slane %v1051_v57, 5 }
 0x15e   :  { %v1059_v10 = vrot.slane %v1052_v39, 4  ;;  %v1060_v8 = vrot.slane %v1053_v23, 3  ;;  %v1061_v16 = vrot.slane %v1054_v44, 2  ;;  %vm2604_vm13 = vcmask 1045508  }
 0x15f   :  { %v1062_v46 = vrot.slane %v1055_v18, 1  ;;  %v1063_v0 = vsel %vm543_vm11, %v1048_v27, %v1056_v40  ;;  %v1064_v14 = vsel %vm545_vm7, %v1057_v24, %v1058_v13  ;;  %vm2605_vm12 = vcmask 1043456  }
 0x160   :  { %v1066_v56 = vsel %vm549_vm5, %v1059_v10, %v1060_v8  ;;  %v1065_v36 = vsel %vm547_vm0, %v1063_v0, %v1064_v14 }
 0x161   :  { %v1067_v26 = vsel %vm551_vm14, %v1061_v16, %v1062_v46 }
 0x162   :  { %v1068_v31 = vsel %vm2604_vm13, %v1066_v56, %v1067_v26 }
 0x163   :  { %v1069_v48 = vsel %vm2605_vm12, %v1065_v36, %v1068_v31 }
 0x164   :  { %1100 = vst [vmem:[%s2468_s2 + $0x8] sm:$0xff] %v1069_v48 }
 0x165   :  { %1176 = dma.done.wait [#allocation3], 2048  }
 0x166   :  { %1177 = vsyncadd [#allocation3], 4294965248 }
 0x167   :  { %1091 = vsyncpa [#allocation3], 1 }

</bundles_post_ra>
